<compile_context>
chip_gen: v5e
topology: v5e:2x2
jax: 0.10.0
libtpu: 0.0.40
codegen_flags: <defaults>
</compile_context>

<pallas_src>
import functools
import math

import jax
import jax.numpy as jnp
from jax.experimental import pallas as pl
from jax.experimental.pallas import tpu as pltpu

EPS = 1e-5


def _round_up(a, m):
    return -(-a // m) * m


# ----------------------------------------------------------------------------- kernel ----
def _enc_conv_kernel(keep_ref, x_ref, halo_ref, gamma_ref, beta_ref, bias_ref, w_ref,
                     o_ref, win_ref, *, C, NR, B, K, Hp):
    """One time-tile: masked LayerNorm -> K-tap ConvTBC (MXU) -> ReLU -> + residual."""
    R, Cp = x_ref.shape
    pad = K // 2
    H = pad * B

    # The last tile may run past the real T*B rows (Pallas clips the boundary DMAs and
    # leaves the rest of the block buffer undefined) -> mask those rows everywhere they
    # could leak into valid rows through the conv taps.
    rows = pl.program_id(0) * R + jax.lax.broadcasted_iota(jnp.int32, (R, 1), 0)
    in_seq = rows < NR
    keep = (keep_ref[...] > 0.5) & in_seq            # masked_fill(mask, 0) + ragged tail

    # LayerNorm over the true C channels (padded lanes hold zeros; gamma/beta zero-padded).
    xm = jnp.where(keep, x_ref[...], 0.0)
    cmask = jax.lax.broadcasted_iota(jnp.int32, (1, Cp), 1) < C
    mu = jnp.sum(xm, axis=-1, keepdims=True) * (1.0 / C)
    d = jnp.where(cmask, xm - mu, 0.0)
    var = jnp.sum(d * d, axis=-1, keepdims=True) * (1.0 / C)
    ln = d * jax.lax.rsqrt(var + EPS) * gamma_ref[...] + beta_ref[...]

    # Rows beyond the real sequence act as the conv's zero padding -> force exactly 0
    # (encoder-masked *real* rows must stay at LN(0) = beta, hence the separate mask).
    conv_in = jnp.where(in_seq, ln, 0.0).astype(jnp.bfloat16)

    # Stitch [lo-halo ; conv_in ; hi-halo] into the 16-row-aligned bf16 window scratch.
    win_ref[0:Hp, :] = halo_ref[0, 0:Hp, :]
    win_ref[Hp:Hp + R, :] = conv_in
    win_ref[Hp + R:Hp + R + Hp, :] = halo_ref[0, Hp:2 * Hp, :]

    # K taps accumulated directly on the MXU (bf16 operands, f32 accumulation); no im2col.
    base = Hp - H
    acc = bias_ref[...] + jnp.dot(win_ref[base:base + R, :], w_ref[0:Cp, :],
                                  preferred_element_type=jnp.float32)
    for k in range(1, K):
        acc = acc + jnp.dot(win_ref[base + k * B:base + k * B + R, :],
                            w_ref[k * Cp:(k + 1) * Cp, :],
                            preferred_element_type=jnp.float32)

    # ReLU + residual (f32 on the VPU). x_ref is re-read here so it is not live across the
    # matmul section.  TODO(synk): training-mode dropout (p > 0) is not implemented; the
    # module is evaluated in eval mode where F.dropout is the identity.
    o_ref[...] = (jnp.maximum(acc, 0.0) + x_ref[...]).astype(o_ref.dtype)


# ------------------------------------------------------------------------ tile policy ----
def _vmem_capacity_bytes():
    try:
        return int(pltpu.get_tpu_info().vmem_capacity_bytes)
    except Exception:
        return 64 * 1024 * 1024          # conservative: v7x per-TensorCore VMEM


def _align_t(t, T, B, align=16):
    """Smallest t' >= t with (t'*B) % align == 0 (bf16 sublane pack); falls back to 8-row
    (f32 sublane) alignment, then to a single full block (always legal)."""
    t = max(1, min(t, T))
    if t == T:
        return T
    for a in (align, 8):
        tt = t
        while tt < T and (tt * B) % a:
            tt += 1
        if (tt * B) % a == 0:
            return min(tt, T)
    return T


def _vmem_model(B, Cp, K, Hp):
    """(bytes per flattened row, fixed bytes) of per-step VMEM footprint (worst case:
    double-buffered f32 I/O blocks, bf16 window scratch, f32 LN/acc temporaries, weights)."""
    per_row = Cp * (2 * 4 + 2 * 4 + 2 + 4 * 4) + 2 * 128 * 4
    fixed = (2 * K * Cp * Cp * 2         # fused conv weight (assume double-buffered)
             + 2 * 3 * Cp * 4            # gamma / beta / bias
             + 2 * 2 * Hp * Cp * 2       # merged halo block (double-buffered)
             + 2 * Hp * Cp * 2)          # window scratch halo rows
    return per_row, fixed


def _auto_t_tile(T, B, Cp, K, Hp, budget):
    per_row, fixed = _vmem_model(B, Cp, K, Hp)
    rows = max(16, (budget - fixed) // per_row)
    rows = min(rows, max(16, (4 << 20) // (Cp * 4)))     # keep f32 I/O blocks <= ~4 MiB
    t = _align_t(max(1, rows // B), T, B)
    n = pl.cdiv(T, t)
    # Prefer >= 2 evenly sized tiles: keeps the DMA pipeline busy and both of v7x's
    # TensorCores fed by the "parallel" grid axis.
    if n == 1 and T * B >= 32:
        t2 = _align_t(pl.cdiv(T, 2), T, B)
        if pl.cdiv(T, t2) >= 2:
            t = t2
    elif n > 1 and n % 2 == 1:
        t2 = _align_t(pl.cdiv(T, n + 1), T, B)
        if pl.cdiv(T, t2) % 2 == 0:
            t = t2
    return t


# ------------------------------------------------------------------------------ halos ----
def _build_halos(x, keep, gamma, beta, nT, t_tile, pad, Hp, Cp):
    """LayerNorm only the 2*pad edge time steps of every tile on the host, packed as one
    (nT, 2*Hp, Cp) bf16 slab: [zeros | lo-halo | hi-halo | zeros] (16-row aligned)."""
    T, B, C = x.shape
    H = pad * B
    if pad == 0:                                           # K == 1: no conv halo needed
        return jnp.zeros((nT, 2 * Hp, Cp), jnp.bfloat16)

    starts = jnp.arange(nT, dtype=jnp.int32)[:, None] * t_tile
    offs = jnp.arange(pad, dtype=jnp.int32)[None, :]

    def side(times):                                       # (nT, pad) absolute time indices
        tf = times.reshape(-1)
        valid = ((tf >= 0) & (tf < T))[:, None, None]
        ts = jnp.clip(tf, 0, T - 1)
        xs = jnp.where(valid & (keep[ts][..., None] > 0.5), x[ts], 0.0)
        mu = jnp.mean(xs, axis=-1, keepdims=True)
        var = jnp.mean(jnp.square(xs - mu), axis=-1, keepdims=True)
        ln = (xs - mu) * jax.lax.rsqrt(var + EPS) * gamma + beta
        ln = jnp.where(valid, ln, 0.0)                     # outside the sequence -> zero pad
        if Cp != C:
            ln = jnp.pad(ln, ((0, 0), (0, 0), (0, Cp - C)))
        return ln.reshape(nT, H, Cp)

    lo = side(starts - pad + offs)                         # pad steps just before each tile
    hi = side(starts + t_tile + offs)                      # pad steps just after each tile
    z = jnp.zeros((nT, Hp - H, Cp), jnp.float32)
    return jnp.concatenate([z, lo, hi, z], axis=1).astype(jnp.bfloat16)


# ---------------------------------------------------------------------------- wrapper ----
def enc_conv_layer(x, encoder_padding_mask, gamma, beta, w_eff, bias, *, t_tile=None):
    """x: (T, B, C) TBC layout; encoder_padding_mask: (B, T) bool or None (True = pad)."""
    T, B, C = x.shape
    K = w_eff.shape[0]
    assert K % 2 == 1, "symmetric zero padding K//2 assumes an odd kernel size"
    pad = K // 2
    in_dtype = x.dtype
    f32 = jnp.float32

    x = x.astype(f32)
    gamma = gamma.astype(f32)
    beta = beta.astype(f32)
    bias = bias.astype(f32)
    w_eff = w_eff.astype(f32)

    Cp = C if C % 128 == 0 else _round_up(C, 128)          # lane-dense channel dim
    H = pad * B
    Hp = _round_up(max(H, 1), 16)                          # 16-row (bf16 sublane) halo pad

    cap = _vmem_capacity_bytes()
    budget = min(int(cap * 0.70), 96 << 20)
    if t_tile is None:
        t_tile = _auto_t_tile(T, B, Cp, K, Hp, budget)
    t_tile = _align_t(t_tile, T, B)
    nT = pl.cdiv(T, t_tile)
    R = t_tile * B
    NR = T * B

    per_row, fixed = _vmem_model(B, Cp, K, Hp)
    need = fixed + per_row * R
    vmem_limit = int(min(cap * 0.85, max(32 << 20, need + (8 << 20))))

    if encoder_padding_mask is None:
        keep = jnp.ones((T, B), f32)
    else:
        keep = 1.0 - encoder_padding_mask.T.astype(f32)    # (T, B); 0 where masked

    # Lane-dense rows; the reshape is free, channel pad only when C is not a lane multiple.
    x2 = x.reshape(NR, C)
    if Cp != C:
        x2 = jnp.pad(x2, ((0, 0), (0, Cp - C)))
    keep2 = keep.reshape(NR, 1)

    padc = (lambda v: v) if Cp == C else (lambda v: jnp.pad(v, (0, Cp - C)))
    gamma2 = padc(gamma).reshape(1, Cp)
    beta2 = padc(beta).reshape(1, Cp)
    bias2 = padc(bias).reshape(1, Cp)
    w2 = w_eff if Cp == C else jnp.pad(w_eff, ((0, 0), (0, Cp - C), (0, Cp - C)))
    w2 = w2.reshape(K * Cp, Cp).astype(jnp.bfloat16)       # fused tap-major conv weight

    halo = _build_halos(x, keep, gamma, beta, nT, t_tile, pad, Hp, Cp)

    kernel = functools.partial(_enc_conv_kernel, C=C, NR=NR, B=B, K=K, Hp=Hp)

    nbytes = lambda a: int(a.size) * a.dtype.itemsize
    cost = pl.CostEstimate(
        flops=int(2 * NR * K * Cp * Cp),
        transcendentals=int(NR),
        bytes_accessed=int(2 * nbytes(x2) + nbytes(keep2) + nbytes(halo)
                           + nbytes(w2) + 3 * Cp * 4),
    )

    def _call(single_buffer_consts):
        const_kw = {}
        if single_buffer_consts:
            const_kw = dict(pipeline_mode=pl.Buffered(1))  # grid-invariant: one VMEM buffer
        grid_spec = pltpu.PrefetchScalarGridSpec(
            num_scalar_prefetch=0,
            grid=(nT,),
            in_specs=[
                pl.BlockSpec((R, 1), lambda i: (i, 0)),                    # keep mask
                pl.BlockSpec((R, Cp), lambda i: (i, 0)),                   # x rows (+residual)
                pl.BlockSpec((1, 2 * Hp, Cp), lambda i: (i, 0, 0)),        # pre-LN'd halos
                pl.BlockSpec((1, Cp), lambda i: (0, 0), **const_kw),       # gamma
                pl.BlockSpec((1, Cp), lambda i: (0, 0), **const_kw),       # beta
                pl.BlockSpec((1, Cp), lambda i: (0, 0), **const_kw),       # conv bias
                pl.BlockSpec((K * Cp, Cp), lambda i: (0, 0), **const_kw),  # fused conv weight
            ],
            out_specs=pl.BlockSpec((R, Cp), lambda i: (i, 0)),
            scratch_shapes=[pltpu.VMEM((R + 2 * Hp, Cp), jnp.bfloat16)],   # conv window
        )
        return pl.pallas_call(
            kernel,
            out_shape=jax.ShapeDtypeStruct((NR, Cp), f32),
            grid_spec=grid_spec,
            compiler_params=pltpu.CompilerParams(
                dimension_semantics=("parallel",),
                vmem_limit_bytes=vmem_limit,
            ),
            cost_estimate=cost,
        )(keep2, x2, halo, gamma2, beta2, bias2, w2)

    try:
        out2 = _call(True)
    except Exception:      # pl.Buffered(1) / pipeline_mode unsupported on this jax version
        out2 = _call(False)

    if Cp != C:
        out2 = out2[:, :C]
    return out2.reshape(T, B, C).astype(in_dtype)


# -------------------------------------------------------------------------- reference ----
def reference(x, encoder_padding_mask, gamma, beta, w_eff, bias, conv_bf16=False):
    """Pure-JAX reference with the PyTorch module's semantics (eval mode).

    conv_bf16=True rounds the conv operands to bf16 (the kernel's intentional MXU feed
    precision) while keeping f32 accumulation, for a tight comparison."""
    T, B, C = x.shape
    K = w_eff.shape[0]
    pad = K // 2
    residual = x
    if encoder_padding_mask is not None:
        x = x * (1.0 - encoder_padding_mask.T[..., None].astype(x.dtype))
    mu = jnp.mean(x, axis=-1, keepdims=True)
    var = jnp.mean((x - mu) ** 2, axis=-1, keepdims=True)
    ln = (x - mu) * jax.lax.rsqrt(var + EPS) * gamma + beta
    w = w_eff
    if conv_bf16:
        ln = ln.astype(jnp.bfloat16).astype(jnp.float32)
        w = w.astype(jnp.bfloat16).astype(jnp.float32)
    lnp = jnp.pad(ln, ((pad, pad), (0, 0), (0, 0)))
    out = jnp.zeros((T, B, C), jnp.float32) + bias
    for k in range(K):
        out = out + jnp.einsum("tbi,io->tbo", lnp[k:k + T], w[k],
                               precision=jax.lax.Precision.HIGHEST)
    return jnp.maximum(out, 0.0) + residual


if __name__ == "__main__":
    # Small shapes: T=18 (not a multiple of the tile -> exercises the ragged last tile),
    # B=2, C=32, K=5.
    T, B, C, K = 18, 2, 32, 5
    dropout = 0.1

    key = jax.random.PRNGKey(0)
    kx, kw, km, kg, kb, kc = jax.random.split(key, 6)

    x = jax.random.normal(kx, (T, B, C), jnp.float32)
    encoder_padding_mask = jax.random.bernoulli(km, 0.2, (B, T))    # True = padded position

    # Conv weight init matching the module; weight_norm(dim=2) with g = ||v|| -> w_eff == v.
    std = math.sqrt(4.0 * (1.0 - dropout) / (K * C))
    v = std * jax.random.normal(kw, (K, C, C), jnp.float32)
    v_norm = jnp.sqrt(jnp.sum(v * v, axis=(0, 1)))
    w_eff = v * (v_norm / v_norm)[None, None, :]
    # LayerNorm affine / conv bias: init is (1, 0, 0); perturb slightly (as a trained model
    # would be) so the masked-row -> beta and bias-add paths are actually exercised.
    gamma = 1.0 + 0.1 * jax.random.normal(kg, (C,), jnp.float32)
    beta = 0.1 * jax.random.normal(kb, (C,), jnp.float32)
    bias = 0.1 * jax.random.normal(kc, (C,), jnp.float32)

    ref_bf16 = reference(x, encoder_padding_mask, gamma, beta, w_eff, bias, conv_bf16=True)
    ref_f32 = reference(x, encoder_padding_mask, gamma, beta, w_eff, bias, conv_bf16=False)

    # Explicit small tile: multi-tile halos + a last tile that does not divide T.
    out = jax.block_until_ready(
        enc_conv_layer(x, encoder_padding_mask, gamma, beta, w_eff, bias, t_tile=8))
    assert out.shape == (T, B, C)
    assert jnp.allclose(out, ref_bf16, atol=5e-3, rtol=5e-3), "mismatch vs bf16-matched reference"
    assert jnp.allclose(out, ref_f32, atol=1e-1, rtol=1e-1), "mismatch vs f32 reference"

    # Automatic (VMEM-budget driven) tiling path.
    out_auto = jax.block_until_ready(
        enc_conv_layer(x, encoder_padding_mask, gamma, beta, w_eff, bias))
    assert jnp.allclose(out_auto, ref_bf16, atol=5e-3, rtol=5e-3), "mismatch (auto tile)"

    # No-mask path.
    out2 = jax.block_until_ready(enc_conv_layer(x, None, gamma, beta, w_eff, bias, t_tile=8))
    ref2 = reference(x, None, gamma, beta, w_eff, bias, conv_bf16=True)
    assert jnp.allclose(out2, ref2, atol=5e-3, rtol=5e-3), "mismatch (no mask) vs reference"

    print("KERNEL_OK")
</pallas_src>

<mosaic_0001>
module attributes {stable_mosaic.version = 11 : i64} {
  func.func @_enc_conv_kernel(%arg0: i32, %arg1: memref<16x1xf32, #tpu.memory_space<vmem>>, %arg2: memref<16x128xf32, #tpu.memory_space<vmem>>, %arg3: memref<1x32x128xbf16, #tpu.memory_space<vmem>>, %arg4: memref<1x128xf32, #tpu.memory_space<vmem>>, %arg5: memref<1x128xf32, #tpu.memory_space<vmem>>, %arg6: memref<1x128xf32, #tpu.memory_space<vmem>>, %arg7: memref<640x128xbf16, #tpu.memory_space<vmem>>, %arg8: memref<16x128xf32, #tpu.memory_space<vmem>>, %arg9: memref<48x128xbf16, #tpu.memory_space<vmem>>) attributes {dimension_semantics = [#tpu.dimension_semantics<parallel>], iteration_bounds = array<i64: 3>, scalar_prefetch = 0 : i64, scratch_operands = 1 : i64, tpu.core_type = #tpu.core_type<tc>, window_params = [{transform_indices = @transform_0, window_bounds = array<i64: 16, 1>}, {transform_indices = @transform_1, window_bounds = array<i64: 16, 128>}, {transform_indices = @transform_2, window_bounds = array<i64: 1, 32, 128>}, {pipeline_mode = #tpu.pipeline_mode<synchronous>, transform_indices = @transform_3, window_bounds = array<i64: 1, 128>}, {pipeline_mode = #tpu.pipeline_mode<synchronous>, transform_indices = @transform_4, window_bounds = array<i64: 1, 128>}, {pipeline_mode = #tpu.pipeline_mode<synchronous>, transform_indices = @transform_5, window_bounds = array<i64: 1, 128>}, {pipeline_mode = #tpu.pipeline_mode<synchronous>, transform_indices = @transform_6, window_bounds = array<i64: 640, 128>}, {transform_indices = @transform_7, window_bounds = array<i64: 16, 128>}]} {
    %c16_i32 = arith.constant 16 : i32
    %0 = arith.muli %arg0, %c16_i32 : i32
    %1 = tpu.iota {dimensions = array<i32: 0>} : vector<16x1xi32>
    %2 = vector.broadcast %0 : i32 to vector<16x1xi32>
    %3 = arith.addi %2, %1 : vector<16x1xi32>
    %c36_i32 = arith.constant 36 : i32
    %4 = vector.broadcast %c36_i32 : i32 to vector<16x1xi32>
    %5 = arith.cmpi slt, %3, %4 : vector<16x1xi32>
    %c0 = arith.constant 0 : index
    %c0_0 = arith.constant 0 : index
    %6 = vector.load %arg1[%c0, %c0_0] : memref<16x1xf32, #tpu.memory_space<vmem>>, vector<16x1xf32>
    %cst = arith.constant 5.000000e-01 : f32
    %7 = vector.broadcast %cst : f32 to vector<16x1xf32>
    %8 = arith.cmpf ogt, %6, %7 : vector<16x1xf32>
    %9 = arith.andi %8, %5 : vector<16x1xi1>
    %c0_1 = arith.constant 0 : index
    %c0_2 = arith.constant 0 : index
    %10 = vector.load %arg2[%c0_1, %c0_2] : memref<16x128xf32, #tpu.memory_space<vmem>>, vector<16x128xf32>
    %cst_3 = arith.constant 0.000000e+00 : f32
    %11 = vector.shape_cast %9 : vector<16x1xi1> to vector<16x1xi1>
    %12 = vector.broadcast %11 : vector<16x1xi1> to vector<16x128xi1>
    %13 = vector.broadcast %cst_3 : f32 to vector<16x128xf32>
    %14 = arith.select %12, %10, %13 : vector<16x128xi1>, vector<16x128xf32>
    %15 = tpu.iota {dimensions = array<i32: 1>} : vector<1x128xi32>
    %c32_i32 = arith.constant 32 : i32
    %16 = vector.broadcast %c32_i32 : i32 to vector<1x128xi32>
    %17 = arith.cmpi slt, %15, %16 : vector<1x128xi32>
    %cst_4 = arith.constant dense<0.000000e+00> : vector<16xf32>
    %18 = vector.multi_reduction <add>, %14, %cst_4 [1] : vector<16x128xf32> to vector<16xf32>
    %19 = vector.shape_cast %18 : vector<16xf32> to vector<16x1xf32>
    %cst_5 = arith.constant 3.125000e-02 : f32
    %20 = vector.broadcast %cst_5 : f32 to vector<16x1xf32>
    %21 = arith.mulf %19, %20 : vector<16x1xf32>
    %22 = vector.broadcast %21 : vector<16x1xf32> to vector<16x128xf32>
    %23 = arith.subf %14, %22 : vector<16x128xf32>
    %cst_6 = arith.constant 0.000000e+00 : f32
    %24 = vector.shape_cast %17 : vector<1x128xi1> to vector<1x128xi1>
    %25 = vector.broadcast %24 : vector<1x128xi1> to vector<16x128xi1>
    %26 = vector.broadcast %cst_6 : f32 to vector<16x128xf32>
    %27 = arith.select %25, %23, %26 : vector<16x128xi1>, vector<16x128xf32>
    %28 = arith.mulf %27, %27 : vector<16x128xf32>
    %cst_7 = arith.constant dense<0.000000e+00> : vector<16xf32>
    %29 = vector.multi_reduction <add>, %28, %cst_7 [1] : vector<16x128xf32> to vector<16xf32>
    %30 = vector.shape_cast %29 : vector<16xf32> to vector<16x1xf32>
    %cst_8 = arith.constant 3.125000e-02 : f32
    %31 = vector.broadcast %cst_8 : f32 to vector<16x1xf32>
    %32 = arith.mulf %30, %31 : vector<16x1xf32>
    %cst_9 = arith.constant 9.99999974E-6 : f32
    %33 = vector.broadcast %cst_9 : f32 to vector<16x1xf32>
    %34 = arith.addf %32, %33 : vector<16x1xf32>
    %35 = math.rsqrt %34 : vector<16x1xf32>
    %36 = vector.broadcast %35 : vector<16x1xf32> to vector<16x128xf32>
    %37 = arith.mulf %27, %36 : vector<16x128xf32>
    %c0_10 = arith.constant 0 : index
    %c0_11 = arith.constant 0 : index
    %38 = vector.load %arg4[%c0_10, %c0_11] : memref<1x128xf32, #tpu.memory_space<vmem>>, vector<1x128xf32>
    %39 = vector.broadcast %38 : vector<1x128xf32> to vector<16x128xf32>
    %40 = arith.mulf %37, %39 : vector<16x128xf32>
    %c0_12 = arith.constant 0 : index
    %c0_13 = arith.constant 0 : index
    %41 = vector.load %arg5[%c0_12, %c0_13] : memref<1x128xf32, #tpu.memory_space<vmem>>, vector<1x128xf32>
    %42 = vector.broadcast %41 : vector<1x128xf32> to vector<16x128xf32>
    %43 = arith.addf %40, %42 : vector<16x128xf32>
    %cst_14 = arith.constant 0.000000e+00 : f32
    %44 = vector.shape_cast %5 : vector<16x1xi1> to vector<16x1xi1>
    %45 = vector.broadcast %44 : vector<16x1xi1> to vector<16x128xi1>
    %46 = vector.broadcast %cst_14 : f32 to vector<16x128xf32>
    %47 = arith.select %45, %43, %46 : vector<16x128xi1>, vector<16x128xf32>
    %48 = arith.truncf %47 : vector<16x128xf32> to vector<16x128xbf16>
    %c0_15 = arith.constant 0 : index
    %c0_16 = arith.constant 0 : index
    %c0_17 = arith.constant 0 : index
    %49 = vector.load %arg3[%c0_15, %c0_16, %c0_17] : memref<1x32x128xbf16, #tpu.memory_space<vmem>>, vector<1x16x128xbf16>
    %50 = vector.shape_cast %49 : vector<1x16x128xbf16> to vector<16x128xbf16>
    %c0_18 = arith.constant 0 : index
    %c0_19 = arith.constant 0 : index
    %51 = vector.load %arg9[%c0_18, %c0_19] : memref<48x128xbf16, #tpu.memory_space<vmem>>, vector<16x128xbf16>
    tpu.vector_store %arg9[%c0_18, %c0_19], %50 {strides = array<i32>} : memref<48x128xbf16, #tpu.memory_space<vmem>>, vector<16x128xbf16>,
    %c16 = arith.constant 16 : index
    %c0_20 = arith.constant 0 : index
    %52 = vector.load %arg9[%c16, %c0_20] : memref<48x128xbf16, #tpu.memory_space<vmem>>, vector<16x128xbf16>
    tpu.vector_store %arg9[%c16, %c0_20], %48 {strides = array<i32>} : memref<48x128xbf16, #tpu.memory_space<vmem>>, vector<16x128xbf16>,
    %c0_21 = arith.constant 0 : index
    %c16_22 = arith.constant 16 : index
    %c0_23 = arith.constant 0 : index
    %53 = vector.load %arg3[%c0_21, %c16_22, %c0_23] : memref<1x32x128xbf16, #tpu.memory_space<vmem>>, vector<1x16x128xbf16>
    %54 = vector.shape_cast %53 : vector<1x16x128xbf16> to vector<16x128xbf16>
    %c32 = arith.constant 32 : index
    %c0_24 = arith.constant 0 : index
    %55 = vector.load %arg9[%c32, %c0_24] : memref<48x128xbf16, #tpu.memory_space<vmem>>, vector<16x128xbf16>
    tpu.vector_store %arg9[%c32, %c0_24], %54 {strides = array<i32>} : memref<48x128xbf16, #tpu.memory_space<vmem>>, vector<16x128xbf16>,
    %c0_25 = arith.constant 0 : index
    %c0_26 = arith.constant 0 : index
    %56 = vector.load %arg6[%c0_25, %c0_26] : memref<1x128xf32, #tpu.memory_space<vmem>>, vector<1x128xf32>
    %c12 = arith.constant 12 : index
    %c0_27 = arith.constant 0 : index
    %57 = vector.load %arg9[%c12, %c0_27] : memref<48x128xbf16, #tpu.memory_space<vmem>>, vector<16x128xbf16>
    %c0_28 = arith.constant 0 : index
    %c0_29 = arith.constant 0 : index
    %58 = vector.load %arg7[%c0_28, %c0_29] : memref<640x128xbf16, #tpu.memory_space<vmem>>, vector<128x128xbf16>
    %cst_30 = arith.constant dense<0.000000e+00> : vector<16x128xf32>
    %59 = tpu.matmul %57, %58, %cst_30 {dimension_numbers = #tpu.dot_dimension_numbers<[1], [0], [0], [1], [0, 0, 1, 1], [], []>} : vector<16x128xbf16>, vector<128x128xbf16>, vector<16x128xf32> -> vector<16x128xf32>
    %60 = vector.broadcast %56 : vector<1x128xf32> to vector<16x128xf32>
    %61 = arith.addf %60, %59 : vector<16x128xf32>
    %c14 = arith.constant 14 : index
    %c0_31 = arith.constant 0 : index
    %62 = vector.load %arg9[%c14, %c0_31] : memref<48x128xbf16, #tpu.memory_space<vmem>>, vector<16x128xbf16>
    %c128 = arith.constant 128 : index
    %c0_32 = arith.constant 0 : index
    %63 = vector.load %arg7[%c128, %c0_32] : memref<640x128xbf16, #tpu.memory_space<vmem>>, vector<128x128xbf16>
    %cst_33 = arith.constant dense<0.000000e+00> : vector<16x128xf32>
    %64 = tpu.matmul %62, %63, %cst_33 {dimension_numbers = #tpu.dot_dimension_numbers<[1], [0], [0], [1], [0, 0, 1, 1], [], []>} : vector<16x128xbf16>, vector<128x128xbf16>, vector<16x128xf32> -> vector<16x128xf32>
    %65 = arith.addf %61, %64 : vector<16x128xf32>
    %c16_34 = arith.constant 16 : index
    %c0_35 = arith.constant 0 : index
    %66 = vector.load %arg9[%c16_34, %c0_35] : memref<48x128xbf16, #tpu.memory_space<vmem>>, vector<16x128xbf16>
    %c256 = arith.constant 256 : index
    %c0_36 = arith.constant 0 : index
    %67 = vector.load %arg7[%c256, %c0_36] : memref<640x128xbf16, #tpu.memory_space<vmem>>, vector<128x128xbf16>
    %cst_37 = arith.constant dense<0.000000e+00> : vector<16x128xf32>
    %68 = tpu.matmul %66, %67, %cst_37 {dimension_numbers = #tpu.dot_dimension_numbers<[1], [0], [0], [1], [0, 0, 1, 1], [], []>} : vector<16x128xbf16>, vector<128x128xbf16>, vector<16x128xf32> -> vector<16x128xf32>
    %69 = arith.addf %65, %68 : vector<16x128xf32>
    %c18 = arith.constant 18 : index
    %c0_38 = arith.constant 0 : index
    %70 = vector.load %arg9[%c18, %c0_38] : memref<48x128xbf16, #tpu.memory_space<vmem>>, vector<16x128xbf16>
    %c384 = arith.constant 384 : index
    %c0_39 = arith.constant 0 : index
    %71 = vector.load %arg7[%c384, %c0_39] : memref<640x128xbf16, #tpu.memory_space<vmem>>, vector<128x128xbf16>
    %cst_40 = arith.constant dense<0.000000e+00> : vector<16x128xf32>
    %72 = tpu.matmul %70, %71, %cst_40 {dimension_numbers = #tpu.dot_dimension_numbers<[1], [0], [0], [1], [0, 0, 1, 1], [], []>} : vector<16x128xbf16>, vector<128x128xbf16>, vector<16x128xf32> -> vector<16x128xf32>
    %73 = arith.addf %69, %72 : vector<16x128xf32>
    %c20 = arith.constant 20 : index
    %c0_41 = arith.constant 0 : index
    %74 = vector.load %arg9[%c20, %c0_41] : memref<48x128xbf16, #tpu.memory_space<vmem>>, vector<16x128xbf16>
    %c512 = arith.constant 512 : index
    %c0_42 = arith.constant 0 : index
    %75 = vector.load %arg7[%c512, %c0_42] : memref<640x128xbf16, #tpu.memory_space<vmem>>, vector<128x128xbf16>
    %cst_43 = arith.constant dense<0.000000e+00> : vector<16x128xf32>
    %76 = tpu.matmul %74, %75, %cst_43 {dimension_numbers = #tpu.dot_dimension_numbers<[1], [0], [0], [1], [0, 0, 1, 1], [], []>} : vector<16x128xbf16>, vector<128x128xbf16>, vector<16x128xf32> -> vector<16x128xf32>
    %77 = arith.addf %73, %76 : vector<16x128xf32>
    %cst_44 = arith.constant 0.000000e+00 : f32
    %78 = vector.broadcast %cst_44 : f32 to vector<16x128xf32>
    %79 = arith.maximumf %77, %78 : vector<16x128xf32>
    %c0_45 = arith.constant 0 : index
    %c0_46 = arith.constant 0 : index
    %80 = vector.load %arg2[%c0_45, %c0_46] : memref<16x128xf32, #tpu.memory_space<vmem>>, vector<16x128xf32>
    %81 = arith.addf %79, %80 : vector<16x128xf32>
    %c0_47 = arith.constant 0 : index
    %c0_48 = arith.constant 0 : index
    %82 = vector.load %arg8[%c0_47, %c0_48] : memref<16x128xf32, #tpu.memory_space<vmem>>, vector<16x128xf32>
    tpu.vector_store %arg8[%c0_47, %c0_48], %81 {strides = array<i32>} : memref<16x128xf32, #tpu.memory_space<vmem>>, vector<16x128xf32>,
    return
  }
  func.func @transform_0(%arg0: i32) -> (i32, i32) {
    %c0_i32 = arith.constant 0 : i32
    %c0_i32_0 = arith.constant 0 : i32
    return %arg0, %c0_i32 : i32, i32
  }
  func.func @transform_1(%arg0: i32) -> (i32, i32) {
    %c0_i32 = arith.constant 0 : i32
    %c0_i32_0 = arith.constant 0 : i32
    return %arg0, %c0_i32 : i32, i32
  }
  func.func @transform_2(%arg0: i32) -> (i32, i32, i32) {
    %c0_i32 = arith.constant 0 : i32
    %c0_i32_0 = arith.constant 0 : i32
    %c0_i32_1 = arith.constant 0 : i32
    return %arg0, %c0_i32, %c0_i32_0 : i32, i32, i32
  }
  func.func @transform_3(%arg0: i32) -> (i32, i32) {
    %c0_i32 = arith.constant 0 : i32
    %c0_i32_0 = arith.constant 0 : i32
    %c0_i32_1 = arith.constant 0 : i32
    return %c0_i32, %c0_i32_0 : i32, i32
  }
  func.func @transform_4(%arg0: i32) -> (i32, i32) {
    %c0_i32 = arith.constant 0 : i32
    %c0_i32_0 = arith.constant 0 : i32
    %c0_i32_1 = arith.constant 0 : i32
    return %c0_i32, %c0_i32_0 : i32, i32
  }
  func.func @transform_5(%arg0: i32) -> (i32, i32) {
    %c0_i32 = arith.constant 0 : i32
    %c0_i32_0 = arith.constant 0 : i32
    %c0_i32_1 = arith.constant 0 : i32
    return %c0_i32, %c0_i32_0 : i32, i32
  }
  func.func @transform_6(%arg0: i32) -> (i32, i32) {
    %c0_i32 = arith.constant 0 : i32
    %c0_i32_0 = arith.constant 0 : i32
    %c0_i32_1 = arith.constant 0 : i32
    return %c0_i32, %c0_i32_0 : i32, i32
  }
  func.func @transform_7(%arg0: i32) -> (i32, i32) {
    %c0_i32 = arith.constant 0 : i32
    %c0_i32_0 = arith.constant 0 : i32
    return %arg0, %c0_i32 : i32, i32
  }
}

module attributes {stable_mosaic.version = 11 : i64} {
  func.func @_enc_conv_kernel(%arg0: i32, %arg1: memref<16x1xf32, #tpu.memory_space<vmem>>, %arg2: memref<16x128xf32, #tpu.memory_space<vmem>>, %arg3: memref<1x32x128xbf16, #tpu.memory_space<vmem>>, %arg4: memref<1x128xf32, #tpu.memory_space<vmem>>, %arg5: memref<1x128xf32, #tpu.memory_space<vmem>>, %arg6: memref<1x128xf32, #tpu.memory_space<vmem>>, %arg7: memref<640x128xbf16, #tpu.memory_space<vmem>>, %arg8: memref<16x128xf32, #tpu.memory_space<vmem>>, %arg9: memref<48x128xbf16, #tpu.memory_space<vmem>>) attributes {dimension_semantics = [#tpu.dimension_semantics<parallel>], iteration_bounds = array<i64: 3>, scalar_prefetch = 0 : i64, scratch_operands = 1 : i64, tpu.core_type = #tpu.core_type<tc>, window_params = [{transform_indices = @transform_0, window_bounds = array<i64: 16, 1>}, {transform_indices = @transform_1, window_bounds = array<i64: 16, 128>}, {transform_indices = @transform_2, window_bounds = array<i64: 1, 32, 128>}, {pipeline_mode = #tpu.pipeline_mode<synchronous>, transform_indices = @transform_3, window_bounds = array<i64: 1, 128>}, {pipeline_mode = #tpu.pipeline_mode<synchronous>, transform_indices = @transform_4, window_bounds = array<i64: 1, 128>}, {pipeline_mode = #tpu.pipeline_mode<synchronous>, transform_indices = @transform_5, window_bounds = array<i64: 1, 128>}, {pipeline_mode = #tpu.pipeline_mode<synchronous>, transform_indices = @transform_6, window_bounds = array<i64: 640, 128>}, {transform_indices = @transform_7, window_bounds = array<i64: 16, 128>}]} {
    %c16_i32 = arith.constant 16 : i32
    %0 = arith.muli %arg0, %c16_i32 : i32
    %1 = tpu.iota {dimensions = array<i32: 0>} : vector<16x1xi32>
    %2 = vector.broadcast %0 : i32 to vector<16x1xi32>
    %3 = arith.addi %2, %1 : vector<16x1xi32>
    %c36_i32 = arith.constant 36 : i32
    %4 = vector.broadcast %c36_i32 : i32 to vector<16x1xi32>
    %5 = arith.cmpi slt, %3, %4 : vector<16x1xi32>
    %c0 = arith.constant 0 : index
    %c0_0 = arith.constant 0 : index
    %6 = vector.load %arg1[%c0, %c0_0] : memref<16x1xf32, #tpu.memory_space<vmem>>, vector<16x1xf32>
    %cst = arith.constant 5.000000e-01 : f32
    %7 = vector.broadcast %cst : f32 to vector<16x1xf32>
    %8 = arith.cmpf ogt, %6, %7 : vector<16x1xf32>
    %9 = arith.andi %8, %5 : vector<16x1xi1>
    %c0_1 = arith.constant 0 : index
    %c0_2 = arith.constant 0 : index
    %10 = vector.load %arg2[%c0_1, %c0_2] : memref<16x128xf32, #tpu.memory_space<vmem>>, vector<16x128xf32>
    %cst_3 = arith.constant 0.000000e+00 : f32
    %11 = vector.shape_cast %9 : vector<16x1xi1> to vector<16x1xi1>
    %12 = vector.broadcast %11 : vector<16x1xi1> to vector<16x128xi1>
    %13 = vector.broadcast %cst_3 : f32 to vector<16x128xf32>
    %14 = arith.select %12, %10, %13 : vector<16x128xi1>, vector<16x128xf32>
    %15 = tpu.iota {dimensions = array<i32: 1>} : vector<1x128xi32>
    %c32_i32 = arith.constant 32 : i32
    %16 = vector.broadcast %c32_i32 : i32 to vector<1x128xi32>
    %17 = arith.cmpi slt, %15, %16 : vector<1x128xi32>
    %cst_4 = arith.constant dense<0.000000e+00> : vector<16xf32>
    %18 = vector.multi_reduction <add>, %14, %cst_4 [1] : vector<16x128xf32> to vector<16xf32>
    %19 = vector.shape_cast %18 : vector<16xf32> to vector<16x1xf32>
    %cst_5 = arith.constant 3.125000e-02 : f32
    %20 = vector.broadcast %cst_5 : f32 to vector<16x1xf32>
    %21 = arith.mulf %19, %20 : vector<16x1xf32>
    %22 = vector.broadcast %21 : vector<16x1xf32> to vector<16x128xf32>
    %23 = arith.subf %14, %22 : vector<16x128xf32>
    %cst_6 = arith.constant 0.000000e+00 : f32
    %24 = vector.shape_cast %17 : vector<1x128xi1> to vector<1x128xi1>
    %25 = vector.broadcast %24 : vector<1x128xi1> to vector<16x128xi1>
    %26 = vector.broadcast %cst_6 : f32 to vector<16x128xf32>
    %27 = arith.select %25, %23, %26 : vector<16x128xi1>, vector<16x128xf32>
    %28 = arith.mulf %27, %27 : vector<16x128xf32>
    %cst_7 = arith.constant dense<0.000000e+00> : vector<16xf32>
    %29 = vector.multi_reduction <add>, %28, %cst_7 [1] : vector<16x128xf32> to vector<16xf32>
    %30 = vector.shape_cast %29 : vector<16xf32> to vector<16x1xf32>
    %cst_8 = arith.constant 3.125000e-02 : f32
    %31 = vector.broadcast %cst_8 : f32 to vector<16x1xf32>
    %32 = arith.mulf %30, %31 : vector<16x1xf32>
    %cst_9 = arith.constant 9.99999974E-6 : f32
    %33 = vector.broadcast %cst_9 : f32 to vector<16x1xf32>
    %34 = arith.addf %32, %33 : vector<16x1xf32>
    %35 = math.rsqrt %34 : vector<16x1xf32>
    %36 = vector.broadcast %35 : vector<16x1xf32> to vector<16x128xf32>
    %37 = arith.mulf %27, %36 : vector<16x128xf32>
    %c0_10 = arith.constant 0 : index
    %c0_11 = arith.constant 0 : index
    %38 = vector.load %arg4[%c0_10, %c0_11] : memref<1x128xf32, #tpu.memory_space<vmem>>, vector<1x128xf32>
    %39 = vector.broadcast %38 : vector<1x128xf32> to vector<16x128xf32>
    %40 = arith.mulf %37, %39 : vector<16x128xf32>
    %c0_12 = arith.constant 0 : index
    %c0_13 = arith.constant 0 : index
    %41 = vector.load %arg5[%c0_12, %c0_13] : memref<1x128xf32, #tpu.memory_space<vmem>>, vector<1x128xf32>
    %42 = vector.broadcast %41 : vector<1x128xf32> to vector<16x128xf32>
    %43 = arith.addf %40, %42 : vector<16x128xf32>
    %cst_14 = arith.constant 0.000000e+00 : f32
    %44 = vector.shape_cast %5 : vector<16x1xi1> to vector<16x1xi1>
    %45 = vector.broadcast %44 : vector<16x1xi1> to vector<16x128xi1>
    %46 = vector.broadcast %cst_14 : f32 to vector<16x128xf32>
    %47 = arith.select %45, %43, %46 : vector<16x128xi1>, vector<16x128xf32>
    %48 = arith.truncf %47 : vector<16x128xf32> to vector<16x128xbf16>
    %c0_15 = arith.constant 0 : index
    %c0_16 = arith.constant 0 : index
    %c0_17 = arith.constant 0 : index
    %49 = vector.load %arg3[%c0_15, %c0_16, %c0_17] : memref<1x32x128xbf16, #tpu.memory_space<vmem>>, vector<1x16x128xbf16>
    %50 = vector.shape_cast %49 : vector<1x16x128xbf16> to vector<16x128xbf16>
    %c0_18 = arith.constant 0 : index
    %c0_19 = arith.constant 0 : index
    %51 = vector.load %arg9[%c0_18, %c0_19] : memref<48x128xbf16, #tpu.memory_space<vmem>>, vector<16x128xbf16>
    tpu.vector_store %arg9[%c0_18, %c0_19], %50 {strides = array<i32>} : memref<48x128xbf16, #tpu.memory_space<vmem>>, vector<16x128xbf16>,
    %c16 = arith.constant 16 : index
    %c0_20 = arith.constant 0 : index
    %52 = vector.load %arg9[%c16, %c0_20] : memref<48x128xbf16, #tpu.memory_space<vmem>>, vector<16x128xbf16>
    tpu.vector_store %arg9[%c16, %c0_20], %48 {strides = array<i32>} : memref<48x128xbf16, #tpu.memory_space<vmem>>, vector<16x128xbf16>,
    %c0_21 = arith.constant 0 : index
    %c16_22 = arith.constant 16 : index
    %c0_23 = arith.constant 0 : index
    %53 = vector.load %arg3[%c0_21, %c16_22, %c0_23] : memref<1x32x128xbf16, #tpu.memory_space<vmem>>, vector<1x16x128xbf16>
    %54 = vector.shape_cast %53 : vector<1x16x128xbf16> to vector<16x128xbf16>
    %c32 = arith.constant 32 : index
    %c0_24 = arith.constant 0 : index
    %55 = vector.load %arg9[%c32, %c0_24] : memref<48x128xbf16, #tpu.memory_space<vmem>>, vector<16x128xbf16>
    tpu.vector_store %arg9[%c32, %c0_24], %54 {strides = array<i32>} : memref<48x128xbf16, #tpu.memory_space<vmem>>, vector<16x128xbf16>,
    %c0_25 = arith.constant 0 : index
    %c0_26 = arith.constant 0 : index
    %56 = vector.load %arg6[%c0_25, %c0_26] : memref<1x128xf32, #tpu.memory_space<vmem>>, vector<1x128xf32>
    %c12 = arith.constant 12 : index
    %c0_27 = arith.constant 0 : index
    %57 = vector.load %arg9[%c12, %c0_27] : memref<48x128xbf16, #tpu.memory_space<vmem>>, vector<16x128xbf16>
    %c0_28 = arith.constant 0 : index
    %c0_29 = arith.constant 0 : index
    %58 = vector.load %arg7[%c0_28, %c0_29] : memref<640x128xbf16, #tpu.memory_space<vmem>>, vector<128x128xbf16>
    %cst_30 = arith.constant dense<0.000000e+00> : vector<16x128xf32>
    %59 = tpu.matmul %57, %58, %cst_30 {dimension_numbers = #tpu.dot_dimension_numbers<[1], [0], [0], [1], [0, 0, 1, 1], [], []>} : vector<16x128xbf16>, vector<128x128xbf16>, vector<16x128xf32> -> vector<16x128xf32>
    %60 = vector.broadcast %56 : vector<1x128xf32> to vector<16x128xf32>
    %61 = arith.addf %60, %59 : vector<16x128xf32>
    %c14 = arith.constant 14 : index
    %c0_31 = arith.constant 0 : index
    %62 = vector.load %arg9[%c14, %c0_31] : memref<48x128xbf16, #tpu.memory_space<vmem>>, vector<16x128xbf16>
    %c128 = arith.constant 128 : index
    %c0_32 = arith.constant 0 : index
    %63 = vector.load %arg7[%c128, %c0_32] : memref<640x128xbf16, #tpu.memory_space<vmem>>, vector<128x128xbf16>
    %cst_33 = arith.constant dense<0.000000e+00> : vector<16x128xf32>
    %64 = tpu.matmul %62, %63, %cst_33 {dimension_numbers = #tpu.dot_dimension_numbers<[1], [0], [0], [1], [0, 0, 1, 1], [], []>} : vector<16x128xbf16>, vector<128x128xbf16>, vector<16x128xf32> -> vector<16x128xf32>
    %65 = arith.addf %61, %64 : vector<16x128xf32>
    %c16_34 = arith.constant 16 : index
    %c0_35 = arith.constant 0 : index
    %66 = vector.load %arg9[%c16_34, %c0_35] : memref<48x128xbf16, #tpu.memory_space<vmem>>, vector<16x128xbf16>
    %c256 = arith.constant 256 : index
    %c0_36 = arith.constant 0 : index
    %67 = vector.load %arg7[%c256, %c0_36] : memref<640x128xbf16, #tpu.memory_space<vmem>>, vector<128x128xbf16>
    %cst_37 = arith.constant dense<0.000000e+00> : vector<16x128xf32>
    %68 = tpu.matmul %66, %67, %cst_37 {dimension_numbers = #tpu.dot_dimension_numbers<[1], [0], [0], [1], [0, 0, 1, 1], [], []>} : vector<16x128xbf16>, vector<128x128xbf16>, vector<16x128xf32> -> vector<16x128xf32>
    %69 = arith.addf %65, %68 : vector<16x128xf32>
    %c18 = arith.constant 18 : index
    %c0_38 = arith.constant 0 : index
    %70 = vector.load %arg9[%c18, %c0_38] : memref<48x128xbf16, #tpu.memory_space<vmem>>, vector<16x128xbf16>
    %c384 = arith.constant 384 : index
    %c0_39 = arith.constant 0 : index
    %71 = vector.load %arg7[%c384, %c0_39] : memref<640x128xbf16, #tpu.memory_space<vmem>>, vector<128x128xbf16>
    %cst_40 = arith.constant dense<0.000000e+00> : vector<16x128xf32>
    %72 = tpu.matmul %70, %71, %cst_40 {dimension_numbers = #tpu.dot_dimension_numbers<[1], [0], [0], [1], [0, 0, 1, 1], [], []>} : vector<16x128xbf16>, vector<128x128xbf16>, vector<16x128xf32> -> vector<16x128xf32>
    %73 = arith.addf %69, %72 : vector<16x128xf32>
    %c20 = arith.constant 20 : index
    %c0_41 = arith.constant 0 : index
    %74 = vector.load %arg9[%c20, %c0_41] : memref<48x128xbf16, #tpu.memory_space<vmem>>, vector<16x128xbf16>
    %c512 = arith.constant 512 : index
    %c0_42 = arith.constant 0 : index
    %75 = vector.load %arg7[%c512, %c0_42] : memref<640x128xbf16, #tpu.memory_space<vmem>>, vector<128x128xbf16>
    %cst_43 = arith.constant dense<0.000000e+00> : vector<16x128xf32>
    %76 = tpu.matmul %74, %75, %cst_43 {dimension_numbers = #tpu.dot_dimension_numbers<[1], [0], [0], [1], [0, 0, 1, 1], [], []>} : vector<16x128xbf16>, vector<128x128xbf16>, vector<16x128xf32> -> vector<16x128xf32>
    %77 = arith.addf %73, %76 : vector<16x128xf32>
    %cst_44 = arith.constant 0.000000e+00 : f32
    %78 = vector.broadcast %cst_44 : f32 to vector<16x128xf32>
    %79 = arith.maximumf %77, %78 : vector<16x128xf32>
    %c0_45 = arith.constant 0 : index
    %c0_46 = arith.constant 0 : index
    %80 = vector.load %arg2[%c0_45, %c0_46] : memref<16x128xf32, #tpu.memory_space<vmem>>, vector<16x128xf32>
    %81 = arith.addf %79, %80 : vector<16x128xf32>
    %c0_47 = arith.constant 0 : index
    %c0_48 = arith.constant 0 : index
    %82 = vector.load %arg8[%c0_47, %c0_48] : memref<16x128xf32, #tpu.memory_space<vmem>>, vector<16x128xf32>
    tpu.vector_store %arg8[%c0_47, %c0_48], %81 {strides = array<i32>} : memref<16x128xf32, #tpu.memory_space<vmem>>, vector<16x128xf32>,
    return
  }
  func.func @transform_0(%arg0: i32) -> (i32, i32) {
    %c0_i32 = arith.constant 0 : i32
    %c0_i32_0 = arith.constant 0 : i32
    return %arg0, %c0_i32 : i32, i32
  }
  func.func @transform_1(%arg0: i32) -> (i32, i32) {
    %c0_i32 = arith.constant 0 : i32
    %c0_i32_0 = arith.constant 0 : i32
    return %arg0, %c0_i32 : i32, i32
  }
  func.func @transform_2(%arg0: i32) -> (i32, i32, i32) {
    %c0_i32 = arith.constant 0 : i32
    %c0_i32_0 = arith.constant 0 : i32
    %c0_i32_1 = arith.constant 0 : i32
    return %arg0, %c0_i32, %c0_i32_0 : i32, i32, i32
  }
  func.func @transform_3(%arg0: i32) -> (i32, i32) {
    %c0_i32 = arith.constant 0 : i32
    %c0_i32_0 = arith.constant 0 : i32
    %c0_i32_1 = arith.constant 0 : i32
    return %c0_i32, %c0_i32_0 : i32, i32
  }
  func.func @transform_4(%arg0: i32) -> (i32, i32) {
    %c0_i32 = arith.constant 0 : i32
    %c0_i32_0 = arith.constant 0 : i32
    %c0_i32_1 = arith.constant 0 : i32
    return %c0_i32, %c0_i32_0 : i32, i32
  }
  func.func @transform_5(%arg0: i32) -> (i32, i32) {
    %c0_i32 = arith.constant 0 : i32
    %c0_i32_0 = arith.constant 0 : i32
    %c0_i32_1 = arith.constant 0 : i32
    return %c0_i32, %c0_i32_0 : i32, i32
  }
  func.func @transform_6(%arg0: i32) -> (i32, i32) {
    %c0_i32 = arith.constant 0 : i32
    %c0_i32_0 = arith.constant 0 : i32
    %c0_i32_1 = arith.constant 0 : i32
    return %c0_i32, %c0_i32_0 : i32, i32
  }
  func.func @transform_7(%arg0: i32) -> (i32, i32) {
    %c0_i32 = arith.constant 0 : i32
    %c0_i32_0 = arith.constant 0 : i32
    return %arg0, %c0_i32 : i32, i32
  }
}

</mosaic_0001>

<bundles_post_ra>
// kernel: tpu_custom_call.1
= control target key start
LH: loop header
LB: loop body
LE: loop exit
PB: predicated region body
PF: predicated region fallthrough
CT: control target
= control target key end

     0   :  { %s1840_s0 = inlined_call_operand.vmem [shape: f32[36,1], index: 0, kind: input, shape index: {}]   ;;  %s1841_s1 = inlined_call_operand.vmem [shape: f32[36,128], index: 1, kind: input, shape index: {}]   ;;  %s1842_s2 = inlined_call_operand.hbm [shape: bf16[3,32,128], index: 2, kind: input, shape index: {}]   ;;  %s1843_s3 = inlined_call_operand.vmem [shape: f32[1,128], index: 3, kind: input, shape index: {}]   ;;  %s1844_s4 = inlined_call_operand.vmem [shape: f32[1,128], index: 4, kind: input, shape index: {}]   ;;  %s1845_s5 = inlined_call_operand.vmem [shape: f32[1,128], index: 5, kind: input, shape index: {}]   ;;  %s1846_s6 = inlined_call_operand.hbm [shape: bf16[640,128], index: 6, kind: input, shape index: {}]   ;;  %s1847_s7 = inlined_call_operand.hbm [shape: f32[36,128], index: 7, kind: output, shape index: {}]  }
   0x1   :  { %1851 = sst [smem:[#allocation12_spill]] %s1846_s6 }
   0x2   :  { %12 = vsyncpa [#allocation4], 0 }
   0x3   :  { %14 = vsyncpa [#allocation4 + $0x1], 0 }
   0x4   :  { %15 = vsyncpa [#allocation7], 0 }
   0x5   :  { %16 = vsyncpa [#allocation5], 0 }
   0x6   :  { %18 = vsyncpa [#allocation5 + $0x1], 0  ;;  %s1607_s24 = smov 0   ;;  %s1609_s25 = smov 0  }
   0x7   :  { %s1611_s26 = smov 0   ;;  %s1613_s27 = smov 0  }
   0x8 LB: > { %s1628_s28 = sadd.s32 4294967295, %s1558_s27   ;;  %s1115_s29 = sadd.s32 4294967294, %s1558_s27   ;;  %s1558_s27 = sphi %s1613_s27, %s1865_s27   ;;  %s1554_s26 = sphi %s1611_s26, %s1864_s26   ;;  %s1550_s25 = sphi %s1609_s25, %s1863_s25   ;;  %s1546_s24 = sphi %s1607_s24, %s1862_s24  }
   0x9   : > { %p96_p0 = scmp.ne.s32.totalorder %s1550_s25, %s1546_s24  ;;  %p97_p1 = scmp.eq.s32.totalorder %s1628_s28, 0 }
   0xa   : > { %p204_p2 = scmp.eq.s32.totalorder %s1628_s28, 2  ;;  %p210_p3 = scmp.eq.s32.totalorder %s1115_s29, 2 }
   0xb   : > { %p1637_p4 = por %p97_p1, %p96_p0  ;;  %p1116_p5 = scmp.ge.s32.totalorder %s1558_s27, 1 }
   0xc   : > { %p1642_p6 = por %p210_p3, %p96_p0  ;;  %p217_p7 = scmp.lt.s32.totalorder %s1558_s27, 4 }
   0xd   : > { %s1854_s6 = sld [smem:[#allocation12_spill]]  ;;  %s1560_s13 = smov [#allocation6]  }
   0xe   : > { %p1650_p8 = pnand %p1116_p5, %p217_p7  ;;  %s239_s14 = sshll.u32 %s1560_s13, 4  ;;  %s240_s14 = int_to_ptr.vmem [resolvable:$true] %s239_s14 }
   0xf   : > { %s1659_s15 = sadd.s32 1, %s1558_s27   ;;  %s1848_s16 = smov 64  }
  0x10   : > { %p1355_p9 = pneg %p1650_p8  ;;  %s1849_s17 = smov 4  }
  0x11   : > { %s80_s18 = ssub.s32 %s1558_s27, %s1659_s15  ;;  %s83_s19 = sadd.s32 1, %s1554_s26 }
  0x12   : > { %p1356_p10 = pnand %p1355_p9, %p97_p1  ;;  %p81_p11 = scmp.eq.s32.totalorder %s80_s18, 0 }
  0x13   : > { %s237_s11 = sshll.u32 %s1854_s6, 4  ;;  %p90_p12 = scmp.ne.s32.totalorder %s1554_s26, %s1550_s25  ;;  %s238_s11 = int_to_ptr.hbm [resolvable:$true] %s237_s11 }
  0x14   : > { %1358 = dma.hbm_to_vmem [thread:$0]  (!%p1356_p10), %s238_s11, 5120, %s240_s14, [#allocation7], %s1848_s16, %s1848_s16, %s1849_s17  }
  0x15   : > { %p91_p13 = scmp.eq.s32.totalorder %s1558_s27, 0  ;;  %p1675_p0 = por %p204_p2, %p90_p12 }
  0x16   : > { %s1671_s20 = scalar_select %p81_p11, %s1554_s26, %s83_s19  }
  0x17   : > { %p1368_p3 = scmp.lt.s32.totalorder %s1558_s27, 3  ;;  %s287_s22 = sand.u32 1, %s1554_s26  }
  0x18   : > { %s1300_s23 = sshll.u32 %s1558_s27, 4  ;;  %p92_p5 = por %p91_p13, %p90_p12 }
  0x19   : > { %s1119_s29 = sshll.u32 %s287_s22, 4  ;;  %s296_s11 = scalar_lea.hbm %s1842_s2, %s1300_s23 }
  0x1a   : > { %s297_s13 = sshll.u32 %s296_s11, 4  ;;  %s291_s14 = scalar_lea.vmem [#allocation3], %s1119_s29  ;;  %s298_s13 = int_to_ptr.hbm [resolvable:$true] %s297_s13 }
  0x1b   : > { %s299_s18 = sshll.u32 %s291_s14, 4  ;;  %p1685_p7 = pnand %p1368_p3, %p92_p5  ;;  %s300_s18 = int_to_ptr.vmem [resolvable:$true] %s299_s18 }
  0x1c   : > { %s288_s16 = scalar_lea.sflag [#allocation4], %s287_s22  ;;  %s1447_s17 = sshra.s32 %s298_s13, 4  ;;  %s1448_s17 = int_to_ptr.hbm [resolvable:$true] %s1447_s17 }
  0x1d   : > { %s1449_s6 = scalar_lea.hbm %s1448_s17, 16  ;;  %p1451_p9 = pneg %p1685_p7 }
  0x1e   : > { %p1450_p2 = scmp.ne.s32.totalorder %s1448_s17, %s1449_s6  ;;  %s1454_s29 = scalar_lea.hbm %s1842_s2, 48 }
  0x1f   : > { %p1455_p12 = scmp.lt.s32.totalorder %s1448_s17, %s1842_s2  ;;  %p1456_p13 = scmp.lt.s32.totalorder %s1454_s29, %s1449_s6 }
  0x20   : > { %p1452_p10 = pnand %p1451_p9, %p1450_p2 }
  0x21   : > { %p1457_p3 = por %p1456_p13, %p1455_p12 }
  0x22   : > { %p1453_p11 = pneg %p1452_p10 }
  0x24   : > { %p1458_p5 = pnand %p1457_p3, %p1453_p11 }
  0x26   : > { %1461 = shalt.err (!%p1458_p5)
}
  0x27   : > { %s1858_s22 = smov 4   ;;  %s1859_s14 = smov 64  }
  0x28   : > { %1362 = dma.hbm_to_vmem [thread:$0]  (!%p1685_p7), %s298_s13, 256, %s300_s18, %s288_s16, %s1859_s14, %s1859_s14, %s1858_s22  }
  0x29   : > { %311 = sbr.rel (%p1650_p8) target bundleno = 660 (0x294), region = 48  ;;  %s1705_s23 = sand.u32 (!%p1650_p8), 1, %s1550_s25  }
  0x2a   : > { %s1123_s6 = sshll.u32 (!%p1650_p8), %s1705_s23, 4  ;;  %s314_s17 = scalar_lea.sflag (!%p1650_p8), [#allocation4], %s1705_s23 }
  0x2b   : > { %s317_s9 = scalar_lea.vmem (!%p1650_p8), [#allocation3], %s1123_s6 }
  0x2e   : > { %1533 = dma.done.wait (%p1637_p4), %s314_s17, 256  }
  0x2f   : > { %1535 = vsyncadd (%p1637_p4), %s314_s17, 4294967040 }
  0x30   : > { %1537 = dma.done.wait (%p97_p1), [#allocation7], 5120  }
  0x31   : > { %1539 = vsyncadd (%p97_p1), [#allocation7], 4294962176  ;;  %s1720_s12 = sshll.u32 %s1628_s28, 1  ;;  %s1130_s16 = sshll.u32 %s1628_s28, 4  ;;  %v406_v0 = vlaneseq  ;;  %v1563_v1 = vmov 0   ;;  %v501_v7 = vld [vmem:[%s317_s9] sm:$0xff]  }
  0x32   : > { %1409 = vset.pattern.permute.xlu0 %v1563_v1  ;;  %p377_p8 = scmp.lt.s32.totalorder %s1720_s12, 4  ;;  %v409_v2 = vstv %s1130_s16  ;;  %v508_v8 = vld [vmem:[%s317_s9 + $0x8] sm:$0xff]   ;;  %503 = vst [vmem:[#allocation2] sm:$0xff] %v501_v7   ;;  %v1307_v31 = vld [vmem:[#allocation6 + $0x30] sm:$0xff]  ;;  %v1305_v34 = vld [vmem:[#allocation6 + $0x20] sm:$0xff]  ;;  %vm539_vm15 = vcmask 1045504  }
  0x33   : > { %v407_v3 = vshrl.u32 %v406_v0, 7  ;;  %510 = vst [vmem:[#allocation2 + $0x10] sm:$0xff] %v508_v8   ;;  %v435_v19 = vand.u32 127, %v406_v0  ;;  %v1308_v30 = vld [vmem:[#allocation6 + $0x38] sm:$0xff]  ;;  %v1306_v32 = vld [vmem:[#allocation6 + $0x28] sm:$0xff]  ;;  %v1323_v37 = vld [vmem:[#allocation6 + $0xb0] sm:$0xff] }
  0x34   : > { %s378_s30 = scalar_select %p377_p8, %s1720_s12, 4  ;;  %592 = vmatpush.bf16.msra.mxu0 %v1308_v30  ;;  %v1324_v33 = vld [vmem:[#allocation6 + $0xb8] sm:$0xff]  ;;  %v1315_v39 = vld [vmem:[#allocation6 + $0x70] sm:$0xff]  ;;  %v1322_v41 = vld [vmem:[#allocation6 + $0xa8] sm:$0xff] }
  0x35   : > { %v1727_v4 = vadd.s32 %v409_v2, %v407_v3  ;;  %v408_v5 = vadd.s32 8, %v407_v3  ;;  %vm436_vm8 = vcmp.lt.s32.totalorder %v435_v19, 32  ;;  %773 = vmatpush.bf16.msra.mxu2 %v1324_v33  ;;  %v1316_v35 = vld [vmem:[#allocation6 + $0x78] sm:$0xff]  ;;  %v1331_v40 = vld [vmem:[#allocation6 + $0xf0] sm:$0xff]  ;;  %v1314_v43 = vld [vmem:[#allocation6 + $0x68] sm:$0xff]  ;;  %s371_s19 = scalar_lea.vmem [#allocation8], %s1123_s6 }
  0x36   : > { %s1127_s13 = sshll.u32 %s378_s30, 3  ;;  %v1332_v36 = vld [vmem:[#allocation6 + $0xf8] sm:$0xff]  ;;  %688 = vmatpush.bf16.msra.mxu1 %v1316_v35  ;;  %v1303_v42 = vld [vmem:[#allocation6 + $0x10] sm:$0xff]  ;;  %v1330_v44 = vld [vmem:[#allocation6 + $0xe8] sm:$0xff]  ;;  %s994_s10 = ssub.s32 (%p1675_p0), 5, %s1720_s12 }
  0x37   : > { %s380_s29 = scalar_lea.vmem %s1840_s0, %s1127_s13  ;;  %vm412_vm0 = vcmp.lt.s32.totalorder %v1727_v4, 36  ;;  %v1733_v6 = vadd.s32 %v409_v2, %v408_v5  ;;  %s394_s22 = scalar_lea.vmem %s1841_s1, %s1127_s13  ;;  %869 = vmatpush.bf16.msra.mxu3 %v1332_v36  ;;  %v1304_v38 = vld [vmem:[#allocation6 + $0x18] sm:$0xff]  ;;  %v1321_v45 = vld [vmem:[#allocation6 + $0xa0] sm:$0xff]  ;;  %v1302_v48 = vld [vmem:[#allocation6 + $0x8] sm:$0xff] }
  0x38   : > { %v414_v9 = vld [vmem:[%s380_s29] sm:$0xff]  ;;  %v415_v10 = vld [vmem:[%s380_s29 + $0x8] sm:$0xff]  ;;  %593 = vmatpush.bf16.msra.mxu0 %v1307_v31  ;;  %v1313_v49 = vld [vmem:[#allocation6 + $0x60] sm:$0xff]  ;;  %s986_s29 = scalar_lea.sflag [#allocation5], %s1705_s23  ;;  %p995_p1 = scmp.lt.s32.totalorder (%p1675_p0), %s994_s10, 2 }
  0x39   : > { %vm416_vm1 = vcmp.gt.f32.partialorder %v414_v9, 0.5  ;;  %vm413_vm3 = vcmp.lt.s32.totalorder %v1733_v6, 36  ;;  %vm417_vm4 = vcmp.gt.f32.partialorder %v415_v10, 0.5  ;;  %v1743_v13 = vld [vmem:[%s394_s22] sm:$0xff]  ;;  %v1746_v16 = vld [vmem:[%s394_s22 + $0x8] sm:$0xff]  ;;  %774 = vmatpush.bf16.msra.mxu2 %v1323_v37  ;;  %v1329_v50 = vld [vmem:[#allocation6 + $0xe0] sm:$0xff] }
  0x3a   : > { %vm418_vm2 = vmand %vm416_vm1, %vm412_vm0  ;;  %689 = vmatpush.bf16.msra.mxu1 %v1315_v39  ;;  %v1320_v52 = vld [vmem:[#allocation6 + $0x98] sm:$0xff]  ;;  %v1301_v53 = vld [vmem:[#allocation6] sm:$0xff]  ;;  %vm816_vm1 = vcmask 1046528  }
  0x3b   : > { %v422_v11 = vsel %vm418_vm2, 1, %v1563_v1  ;;  %vm419_vm5 = vmand %vm417_vm4, %vm413_vm3  ;;  %870 = vmatpush.bf16.msra.mxu3 %v1331_v40  ;;  %v1312_v54 = vld [vmem:[#allocation6 + $0x58] sm:$0xff]  ;;  %v1319_v57 = vld [vmem:[#allocation6 + $0x90] sm:$0xff] }
  0x3c   : > { %425 = vperm.xlu0 %1409, %v422_v11   ;;  %v423_v12 = vsel %vm419_vm5, 1, %v1563_v1  ;;  %594 = vmatpush.bf16.msra.mxu0 %v1306_v32  ;;  %v1328_v55 = vld [vmem:[#allocation6 + $0xd8] sm:$0xff]  ;;  %v1311_v59 = vld [vmem:[#allocation6 + $0x50] sm:$0xff]  ;;  %v1318_v63 = vld [vmem:[#allocation6 + $0x88] sm:$0xff] }
  0x3d   : > { %775 = vmatpush.bf16.msra.mxu2 %v1322_v41  ;;  %v1340_v56 = vld [vmem:[#allocation6 + $0x138] sm:$0xff]  ;;  %v1327_v60 = vld [vmem:[#allocation6 + $0xd0] sm:$0xff]  ;;  %v1310_v3 = vld [vmem:[#allocation6 + $0x48] sm:$0xff] }
  0x3e   : > { %690 = vmatpush.bf16.msra.mxu1 %v1314_v43  ;;  %v1339_v62 = vld [vmem:[#allocation6 + $0x130] sm:$0xff]  ;;  %v1326_v5 = vld [vmem:[#allocation6 + $0xc8] sm:$0xff]  ;;  %v1317_v8 = vld [vmem:[#allocation6 + $0x80] sm:$0xff] }
  0x3f   : > { %871 = vmatpush.bf16.msra.mxu3 %v1330_v44  ;;  %v1338_v7 = vld [vmem:[#allocation6 + $0x128] sm:$0xff]  ;;  %v1309_v11 = vld [vmem:[#allocation6 + $0x40] sm:$0xff] }
  0x40   : > { %595 = vmatpush.bf16.msra.mxu0 %v1305_v34  ;;  %v1411_v31 = vld [vmem:[%s1844_s4] ss:$0 sm:$0xff]  ;;  %v512_v43 = vld [vmem:[#allocation2 + $0x4] sm:$0xc] }
  0x41   : > { %776 = vmatpush.bf16.msra.mxu2 %v1321_v45  ;;  %v1334_v33 = vld [vmem:[#allocation6 + $0x108] sm:$0xff] }
  0x42   : > { %691 = vmatpush.bf16.msra.mxu1 %v1313_v49  ;;  %v611_v44 = vld [vmem:[#allocation2 + $0x4] sm:$0x8] }
  0x43   : > { %872 = vmatpush.bf16.msra.mxu3 %v1329_v50 }
  0x44   : > { %428 = vperm.xlu0 %1409, %v423_v12   ;;  %596 = vmatpush.bf16.msra.mxu0 %v1304_v38 }
  0x45   : > { %777 = vmatpush.bf16.msra.mxu2 %v1320_v52 }
  0x46   : > { %692 = vmatpush.bf16.msra.mxu1 %v1312_v54 }
  0x47   : > { %873 = vmatpush.bf16.msra.mxu3 %v1328_v55 }
  0x48   : > { %597 = vmatpush.bf16.msra.mxu0 %v1303_v42  ;;  %v791_v42 = vld [vmem:[#allocation2 + $0x10] sm:$0x1] }
  0x49   : > { %778 = vmatpush.bf16.msra.mxu2 %v1319_v57  ;;  %v813_v45 = vunpack.c.l.b16 %v791_v42 }
  0x4a   : > { %693 = vmatpush.bf16.msra.mxu1 %v1311_v59 }
  0x4b   : > { %874 = vmatpush.bf16.msra.mxu3 %v1327_v60  ;;  %v815_v50 = vpack.c.b16 %v813_v45, %v813_v45 }
  0x4c   : > { %598 = vmatpush.bf16.msra.mxu0 %v1302_v48 }
  0x4d   : > { %779 = vmatpush.bf16.msra.mxu2 %v1318_v63 }
  0x4e   : > { %694 = vmatpush.bf16.msra.mxu1 %v1310_v3 }
  0x4f   : > { %875 = vmatpush.bf16.msra.mxu3 %v1326_v5 }
  0x50   : > { %599 = vmatpush.bf16.msra.mxu0 %v1301_v53 }
  0x51   : > { %780 = vmatpush.bf16.msra.mxu2 %v1317_v8 }
  0x52   : > { %695 = vmatpush.bf16.msra.mxu1 %v1309_v11 }
  0x54   : > { %961 = vmatpush.bf16.msrb.mxu0 %v1340_v56 }
  0x58   : > { %962 = vmatpush.bf16.msrb.mxu0 %v1339_v62 }
  0x5c   : > { %963 = vmatpush.bf16.msrb.mxu0 %v1338_v7 }
  0xae   : > { %v426_v14 = vpop.permute.xlu0 %425 }
  0xaf   : > { %vm430_vm6 = vcmp.eq.s32.totalorder %v426_v14, 1  ;;  %v1325_v14 = vld [vmem:[#allocation6 + $0xc0] sm:$0xff] }
  0xb0   : > { %v432_v15 = vsel %vm430_vm6, %v1743_v13, 0.0  ;;  %876 = vmatpush.bf16.msra.mxu3 %v1325_v14 }
  0xb1   : > { %437 = vadd.xlane.f32.xlu1 %v432_v15 }
  0xb6   : > { %v429_v17 = vpop.permute.xlu0 %428 }
  0xb7   : > { %vm431_vm7 = vcmp.eq.s32.totalorder %v429_v17, 1 }
  0xb8   : > { %v433_v18 = vsel %vm431_vm7, %v1746_v16, 0.0 }
  0xb9   : > { %439 = vadd.xlane.f32.xlu1 %v433_v18 }
 0x124   : > { %v438_v20 = vpop.xlane.xlu1 %437 }
 0x125   : > { %v441_v21 = vmul.f32 0.03125, %v438_v20 }
 0x127   : > { %v443_v22 = vsub.f32 %v432_v15, %v441_v21  ;;  %v1337_v15 = vld [vmem:[#allocation6 + $0x120] sm:$0xff] }
 0x128   : > { %964 = vmatpush.bf16.msrb.mxu0 %v1337_v15 }
 0x129   : > { %v1749_v23 = vsel %vm436_vm8, %v443_v22, 0.0  ;;  %v1336_v22 = vld [vmem:[#allocation6 + $0x118] sm:$0xff] }
 0x12a   : > { %v449_v24 = vmul.f32 %v1749_v23, %v1749_v23 }
 0x12c   : > { %451 = vadd.xlane.f32.xlu2 %v449_v24  ;;  %v440_v25 = vpop.xlane.xlu1 %439  ;;  %965 = vmatpush.bf16.msrb.mxu0 %v1336_v22 }
 0x12d   : > { %v442_v26 = vmul.f32 0.03125, %v440_v25  ;;  %v1410_v25 = vld [vmem:[%s1843_s3] ss:$0 sm:$0xff] }
 0x12f   : > { %v444_v27 = vsub.f32 %v433_v18, %v442_v26 }
 0x131   : > { %v1753_v28 = vsel %vm436_vm8, %v444_v27, 0.0  ;;  %v1335_v27 = vld [vmem:[#allocation6 + $0x110] sm:$0xff] }
 0x132   : > { %v450_v29 = vmul.f32 %v1753_v28, %v1753_v28  ;;  %966 = vmatpush.bf16.msrb.mxu0 %v1335_v27 }
 0x134   : > { %453 = vadd.xlane.f32.xlu2 %v450_v29 }
 0x136   : > { %967 = vmatpush.bf16.msrb.mxu0 %v1334_v33 }
 0x19f   : > { %v452_v46 = vpop.xlane.xlu2 %451 }
 0x1a0   : > { %v455_v47 = vmul.f32 0.03125, %v452_v46  ;;  %v534_v46 = vunpack.c.l.b16 %v512_v43 }
 0x1a2   : > { %v457_v51 = vadd.f32 1e-05, %v455_v47 }
 0x1a4   : > { %1413 = vrsqrt.f32 %v457_v51  ;;  %vm465_vm10 = vweird.f32 %v457_v51 }
 0x1a7   : > { %v454_v58 = vpop.xlane.xlu2 %453 }
 0x1a8   : > { %v456_v61 = vmul.f32 0.03125, %v454_v58 }
 0x1aa   : > { %v1414_v0 = vpop.eup %1413  ;;  %v458_v1 = vadd.f32 1e-05, %v456_v61  ;;  %v818_v61 = vrot.slane %v815_v50, 1 }
 0x1ab   : > { %v460_v2 = vmul.f32 %v1414_v0, %v457_v51  ;;  %vm466_vm9 = vweird.f32 %v1414_v0 }
 0x1ac   : > { %1415 = vrsqrt.f32 %v458_v1  ;;  %vm467_vm11 = vmor %vm465_vm10, %vm466_vm9  ;;  %vm475_vm13 = vweird.f32 %v458_v1 }
 0x1ad   : > { %v461_v9 = vmul.f32 %v1414_v0, %v460_v2 }
 0x1af   : > { %v462_v10 = vmul.f32 0.5, %v461_v9  ;;  %v886_v9 = vld [vmem:[#allocation2 + $0x10] sm:$0x3] }
 0x1b0   : > { %v906_v11 = vunpack.c.l.b16 %v886_v9 }
 0x1b1   : > { %v463_v12 = vsub.f32 1.5, %v462_v10 }
 0x1b2   : > { %v1416_v17 = vpop.eup %1415  ;;  %v908_v14 = vpack.c.b16 %v906_v11, %v906_v11 }
 0x1b3   : > { %v464_v18 = vmul.f32 %v1414_v0, %v463_v12  ;;  %v470_v19 = vmul.f32 %v1416_v17, %v458_v1  ;;  %vm476_vm12 = vweird.f32 %v1416_v17 }
 0x1b4   : > { %vm477_vm14 = vmor %vm475_vm13, %vm476_vm12 }
 0x1b5   : > { %v468_v20 = vsel %vm467_vm11, %v1414_v0, %v464_v18  ;;  %v471_v21 = vmul.f32 %v1416_v17, %v470_v19  ;;  %v1412_v19 = vld [vmem:[%s1845_s5] ss:$0 sm:$0xff] }
 0x1b6   : > { %v479_v26 = vmul.f32 %v468_v20, %v1749_v23  ;;  %v1333_v23 = vld [vmem:[#allocation6 + $0x100] sm:$0xff] }
 0x1b7   : > { %v472_v24 = vmul.f32 0.5, %v471_v21  ;;  %968 = vmatpush.bf16.msrb.mxu0 %v1333_v23 }
 0x1b8   : > { %v485_v32 = vmul.f32 %v1410_v25, %v479_v26 }
 0x1b9   : > { %v473_v29 = vsub.f32 1.5, %v472_v24 }
 0x1ba   : > { %v491_v36 = vadd.f32 %v1411_v31, %v485_v32 }
 0x1bb   : > { %v474_v30 = vmul.f32 %v1416_v17, %v473_v29 }
 0x1bc   : > { %v497_v39 = vsel %vm412_vm0, %v491_v36, 0.0  ;;  %vm635_vm0 = vcmask 1044480  }
 0x1bd   : > { %v478_v34 = vsel %vm477_vm14, %v1416_v17, %v474_v30  ;;  %v910_v17 = vrot.slane %v908_v14, 2 }
 0x1be   : > { %v480_v35 = vmul.f32 %v478_v34, %v1753_v28  ;;  %v631_v28 = vunpack.c.l.b16 %v611_v44 }
 0x1c0   : > { %v486_v37 = vmul.f32 %v1410_v25, %v480_v35 }
 0x1c2   : > { %v492_v38 = vadd.f32 %v1411_v31, %v486_v37 }
 0x1c4   : > { %v498_v40 = vsel %vm413_vm3, %v492_v38, 0.0 }
 0x1c5   : > { %v1345_v41 = vpack.c.bf16 %v498_v40, %v497_v39 }
 0x1c7   : > { %1347 = vst [vmem:[#allocation2 + $0x8] sm:$0xff] %v1345_v41  }
 0x1ce   : > { %v513_v47 = vld [vmem:[#allocation2 + $0x8] sm:$0xff]  }
 0x1cf   : > { %v514_v48 = vld [vmem:[#allocation2 + $0xc] sm:$0x3]  ;;  %v535_v51 = vunpack.c.l.b16 %v513_v47  ;;  %v789_v53 = vld [vmem:[#allocation2 + $0x8] sm:$0xe]  ;;  %781 = vmatmul.bf16.vlgmr.msra.gmra.mxu2 %v513_v47 }
 0x1d0   : > { %v612_v49 = vld [vmem:[#allocation2 + $0xc] sm:$0x7]  ;;  %v536_v52 = vunpack.c.l.b16 %v514_v48  ;;  %v811_v6 = vunpack.c.l.b16 %v789_v53  ;;  %v885_v8 = vld [vmem:[#allocation2 + $0x8] sm:$0xc] }
 0x1d1   : > { %v632_v4 = vunpack.c.l.b16 %v612_v49  ;;  %v790_v54 = vld [vmem:[#allocation2 + $0xc] sm:$0xf]  ;;  %v537_v56 = vpack.c.b16 %v535_v51, %v534_v46  ;;  %v633_v58 = vpack.c.b16 %v535_v51, %v631_v28  ;;  %v905_v10 = vunpack.c.l.b16 %v885_v8 }
 0x1d2   : > { %v812_v55 = vunpack.c.l.b16 %v790_v54  ;;  %v538_v57 = vpack.c.b16 %v536_v52, %v536_v52 }
 0x1d3   : > { %v634_v59 = vpack.c.b16 %v632_v4, %v632_v4  ;;  %v540_v62 = vrot.slane %v537_v56, 2  ;;  %v636_v0 = vrot.slane %v633_v58, 3 }
 0x1d4   : > { %v814_v60 = vpack.c.b16 %v812_v55, %v811_v6  ;;  %v541_v63 = vrot.slane %v538_v57, 2  ;;  %v907_v12 = vpack.c.b16 %v812_v55, %v905_v10 }
 0x1d5   : > { %v637_v1 = vrot.slane %v634_v59, 3 }
 0x1d6   : > { %v817_v2 = vrot.slane %v814_v60, 1  ;;  %v542_v3 = vsel %vm539_vm15, %v540_v62, %v541_v63  ;;  %v909_v15 = vrot.slane %v907_v12, 2 }
 0x1d7   : > { %600 = vmatmul.bf16.vlgmr.msra.gmra.mxu0 %v542_v3  ;;  %v638_v5 = vsel %vm635_vm0, %v636_v0, %v637_v1 }
 0x1d8   : > { %v819_v7 = vsel %vm816_vm1, %v817_v2, %v818_v61  ;;  %696 = vmatmul.bf16.vlgmr.msra.gmra.mxu1 %v638_v5  ;;  %v911_v18 = vsel %vm539_vm15, %v909_v15, %v910_v17 }
 0x1d9   : > { %877 = vmatmul.bf16.vlgmr.msra.gmra.mxu3 %v819_v7 }
 0x1e7   : > { %969 = vmatmul.bf16.vlgmr.msrb.gmra.mxu0 %v911_v18 }
 0x252   : > { %v782_v24 = vpop.f32.mrf.mxu2 }
 0x254   : > { %v601_v20 = vpop.f32.mrf.mxu0 }
 0x255   : > { %v609_v21 = vadd.f32 %v1412_v19, %v601_v20  ;;  %v697_v22 = vpop.f32.mrf.mxu1 }
 0x257   : > { %v702_v25 = vadd.f32 %v697_v22, %v609_v21 }
 0x259   : > { %v787_v29 = vadd.f32 %v782_v24, %v702_v25 }
 0x25a   : > { %v784_v34 = vpop.f32.mrf.mxu2 }
 0x25c   : > { %v603_v26 = vpop.f32.mrf.mxu0  ;;  %v878_v27 = vpop.f32.mrf.mxu3 }
 0x25d   : > { %v610_v30 = vadd.f32 %v1412_v19, %v603_v26  ;;  %v699_v31 = vpop.f32.mrf.mxu1  ;;  %v883_v32 = vadd.f32 %v878_v27, %v787_v29 }
 0x25f   : > { %v703_v33 = vadd.f32 %v699_v31, %v610_v30 }
 0x261   : > { %v788_v37 = vadd.f32 %v784_v34, %v703_v33 }
 0x264   : > { %v970_v35 = vpop.f32.mrf.mxu0  ;;  %v880_v38 = vpop.f32.mrf.mxu3 }
 0x265   : > { %v975_v36 = vadd.f32 %v970_v35, %v883_v32  ;;  %v884_v40 = vadd.f32 %v880_v38, %v788_v37 }
 0x267   : > { %v977_v23 = vmax.f32 %v975_v36, 0.0 }
 0x269   : > { %v981_v39 = vadd.f32 %v977_v23, %v1743_v13 }
 0x26b   : > { %983 = vst [vmem:[%s371_s19] sm:$0xff] %v981_v39 }
 0x26c   : > { %v972_v41 = vpop.f32.mrf.mxu0 }
 0x26d   : > { %v976_v42 = vadd.f32 %v972_v41, %v884_v40 }
 0x26f   : > { %v978_v43 = vmax.f32 %v976_v42, 0.0  ;;  %992 = sbr.rel (!%p1675_p0) target bundleno = 660 (0x294), region = 60 }
 0x271   : > { %v982_v44 = vadd.f32 %v978_v43, %v1746_v16 }
 0x273   : > { %984 = vst [vmem:[%s371_s19 + $0x8] sm:$0xff] %v982_v44 }
 0x274   : > { %s1867_s10 = smov (!%p995_p1, %s994_s10), 2 }
 0x275   : > { %s1293_s11 = sshll.u32 %s1867_s10, 3 }
 0x276   : > { %s998_s6 = ssub.s32 16, %s1293_s11 }
 0x277   : > { %s999_s22 = sshll.u32 %s998_s6, 4 }
 0x278   : > { %1000 = vsyncadd %s986_s29, %s999_s22  ;;  %p1787_p4 = scmp.ne.s32.totalorder %s1293_s11, 0  ;;  %s1003_s12 = scalar_lea.hbm %s1847_s7, %s1130_s16 }
 0x279   : > { %s1005_s9 = sshll.u32 %s371_s19, 4  ;;  %s1007_s30 = sshll.u32 %s1003_s12, 4  ;;  %s1796_s9 = int_to_ptr.vmem [resolvable:$true] %s1005_s9  ;;  %s1798_s30 = int_to_ptr.hbm [resolvable:$true] %s1007_s30 }
 0x27a   : > { %s1850_s13 = sshll.u32 %s1867_s10, 7  ;;  %s1477_s18 = sshra.s32 %s1796_s9, 4  ;;  %s1478_s18 = int_to_ptr.vmem [resolvable:$true] %s1477_s18 }
 0x27b   : > { %s1479_s11 = sshrl.u32 %s1850_s13, 4  ;;  %s1564_s28 = smov [#allocation8]  }
 0x27c   : > { %s1484_s6 = scalar_lea.vmem %s1478_s18, %s1479_s11  ;;  %s1488_s22 = scalar_lea.vmem %s1564_s28, 32 }
 0x27d   : > { %p1485_p0 = scmp.ne.s32.totalorder %s1478_s18, %s1484_s6  ;;  %p1490_p9 = scmp.lt.s32.totalorder %s1488_s22, %s1484_s6 }
 0x27f   : > { %p1486_p7 = pnand %p1485_p0, %p1787_p4 }
 0x281   : > { %p1487_p2 = pneg %p1486_p7 }
 0x283   : > { %p1492_p10 = pnand %p1490_p9, %p1487_p2 }
 0x285   : > { %1495 = shalt.err (!%p1492_p10)
}
 0x286   : > { %s1496_s16 = sshra.s32 %s1798_s30, 4  ;;  %s1507_s12 = scalar_lea.hbm %s1847_s7, 40  ;;  %s1497_s16 = int_to_ptr.hbm [resolvable:$true] %s1496_s16 }
 0x287   : > { %s1503_s19 = scalar_lea.hbm %s1497_s16, %s1479_s11  ;;  %p1508_p3 = scmp.lt.s32.totalorder %s1497_s16, %s1847_s7 }
 0x288   : > { %p1504_p11 = scmp.ne.s32.totalorder %s1497_s16, %s1503_s19  ;;  %p1509_p5 = scmp.lt.s32.totalorder %s1507_s12, %s1503_s19 }
 0x28a   : > { %p1505_p12 = pnand %p1504_p11, %p1787_p4  ;;  %p1510_p8 = por %p1509_p5, %p1508_p3 }
 0x28c   : > { %p1506_p13 = pneg %p1505_p12 }
 0x28e   : > { %p1511_p1 = pnand %p1510_p8, %p1506_p13 }
 0x290   : > { %1514 = shalt.err (!%p1511_p1)
}
 0x291   : > { %s1565_s6 = smov 128   ;;  %s1566_s11 = smov 8  }
 0x292   : > { %s1861_s28 = sshll.u32 %s1867_s10, 7 }
 0x293   : > { %1013 = dma.vmem_to_hbm [thread:$0]  (%p1787_p4), %s1796_s9, %s1861_s28, %s1798_s30, %s986_s29, %s1565_s6, %s1565_s6, %s1566_s11  }
 0x294 PF: > { %p1370_p0 = scmp.ge.s32.totalorder %s1558_s27, 2  ;;  %s1022_s13 = sand.u32 1, %s1546_s24  }
 0x295   : > { %s1023_s22 = scalar_lea.sflag [#allocation5], %s1022_s13 }
 0x296   : > { %p1364_p7 = pnand %p1370_p0, %p1642_p6 }
 0x298   : > { %p1365_p2 = pneg %p1364_p7 }
 0x29a   : > { %1541 = dma.done.wait (%p1365_p2), %s1023_s22, 256  }
 0x29b   : > { %1543 = vsyncadd (%p1365_p2), %s1023_s22, 4294967040  ;;  %p21_p9 = scmp.ge.s32.totalorder %s1659_s15, 5   ;;  %s1862_s24 = smov %s1550_s25 }
 0x29c   : > { %s1863_s25 = smov %s1554_s26  ;;  %s1864_s26 = smov %s1671_s20 }
 0x29d   : > { %s1865_s27 = smov %s1659_s15  ;;  %23 = sbr.rel (!%p21_p9) target bundleno = 8 (0x8), region = 103 }
 0x2a2   :  { %1029 = vsyncpa [#allocation4], 1 }
 0x2a3   :  { %1031 = vsyncpa [#allocation4 + $0x1], 1 }
 0x2a4   :  { %1032 = vsyncpa [#allocation7], 1 }
 0x2a5   :  { %1033 = vsyncpa [#allocation5], 1 }
 0x2a6   :  { %1035 = vsyncpa [#allocation5 + $0x1], 1 }

// kernel: tpu_custom_call.1
= control target key start
LH: loop header
LB: loop body
LE: loop exit
PB: predicated region body
PF: predicated region fallthrough
CT: control target
= control target key end

     0   :  { %s1840_s0 = inlined_call_operand.vmem [shape: f32[36,1], index: 0, kind: input, shape index: {}]   ;;  %s1841_s1 = inlined_call_operand.vmem [shape: f32[36,128], index: 1, kind: input, shape index: {}]   ;;  %s1842_s2 = inlined_call_operand.hbm [shape: bf16[3,32,128], index: 2, kind: input, shape index: {}]   ;;  %s1843_s3 = inlined_call_operand.vmem [shape: f32[1,128], index: 3, kind: input, shape index: {}]   ;;  %s1844_s4 = inlined_call_operand.vmem [shape: f32[1,128], index: 4, kind: input, shape index: {}]   ;;  %s1845_s5 = inlined_call_operand.vmem [shape: f32[1,128], index: 5, kind: input, shape index: {}]   ;;  %s1846_s6 = inlined_call_operand.hbm [shape: bf16[640,128], index: 6, kind: input, shape index: {}]   ;;  %s1847_s7 = inlined_call_operand.hbm [shape: f32[36,128], index: 7, kind: output, shape index: {}]  }
   0x1   :  { %1851 = sst [smem:[#allocation12_spill]] %s1846_s6 }
   0x2   :  { %12 = vsyncpa [#allocation4], 0 }
   0x3   :  { %14 = vsyncpa [#allocation4 + $0x1], 0 }
   0x4   :  { %15 = vsyncpa [#allocation7], 0 }
   0x5   :  { %16 = vsyncpa [#allocation5], 0 }
   0x6   :  { %18 = vsyncpa [#allocation5 + $0x1], 0  ;;  %s1607_s24 = smov 0   ;;  %s1609_s25 = smov 0  }
   0x7   :  { %s1611_s26 = smov 0   ;;  %s1613_s27 = smov 0  }
   0x8 LB: > { %s1628_s28 = sadd.s32 4294967295, %s1558_s27   ;;  %s1115_s29 = sadd.s32 4294967294, %s1558_s27   ;;  %s1558_s27 = sphi %s1613_s27, %s1865_s27   ;;  %s1554_s26 = sphi %s1611_s26, %s1864_s26   ;;  %s1550_s25 = sphi %s1609_s25, %s1863_s25   ;;  %s1546_s24 = sphi %s1607_s24, %s1862_s24  }
   0x9   : > { %p96_p0 = scmp.ne.s32.totalorder %s1550_s25, %s1546_s24  ;;  %p97_p1 = scmp.eq.s32.totalorder %s1628_s28, 0 }
   0xa   : > { %p204_p2 = scmp.eq.s32.totalorder %s1628_s28, 2  ;;  %p210_p3 = scmp.eq.s32.totalorder %s1115_s29, 2 }
   0xb   : > { %p1637_p4 = por %p97_p1, %p96_p0  ;;  %p1116_p5 = scmp.ge.s32.totalorder %s1558_s27, 1 }
   0xc   : > { %p1642_p6 = por %p210_p3, %p96_p0  ;;  %p217_p7 = scmp.lt.s32.totalorder %s1558_s27, 4 }
   0xd   : > { %s1854_s6 = sld [smem:[#allocation12_spill]]  ;;  %s1560_s13 = smov [#allocation6]  }
   0xe   : > { %p1650_p8 = pnand %p1116_p5, %p217_p7  ;;  %s239_s14 = sshll.u32 %s1560_s13, 4  ;;  %s240_s14 = int_to_ptr.vmem [resolvable:$true] %s239_s14 }
   0xf   : > { %s1659_s15 = sadd.s32 1, %s1558_s27   ;;  %s1848_s16 = smov 64  }
  0x10   : > { %p1355_p9 = pneg %p1650_p8  ;;  %s1849_s17 = smov 4  }
  0x11   : > { %s80_s18 = ssub.s32 %s1558_s27, %s1659_s15  ;;  %s83_s19 = sadd.s32 1, %s1554_s26 }
  0x12   : > { %p1356_p10 = pnand %p1355_p9, %p97_p1  ;;  %p81_p11 = scmp.eq.s32.totalorder %s80_s18, 0 }
  0x13   : > { %s237_s11 = sshll.u32 %s1854_s6, 4  ;;  %p90_p12 = scmp.ne.s32.totalorder %s1554_s26, %s1550_s25  ;;  %s238_s11 = int_to_ptr.hbm [resolvable:$true] %s237_s11 }
  0x14   : > { %1358 = dma.hbm_to_vmem [thread:$0]  (!%p1356_p10), %s238_s11, 5120, %s240_s14, [#allocation7], %s1848_s16, %s1848_s16, %s1849_s17  }
  0x15   : > { %p91_p13 = scmp.eq.s32.totalorder %s1558_s27, 0  ;;  %p1675_p0 = por %p204_p2, %p90_p12 }
  0x16   : > { %s1671_s20 = scalar_select %p81_p11, %s1554_s26, %s83_s19  }
  0x17   : > { %p1368_p3 = scmp.lt.s32.totalorder %s1558_s27, 3  ;;  %s287_s22 = sand.u32 1, %s1554_s26  }
  0x18   : > { %s1300_s23 = sshll.u32 %s1558_s27, 4  ;;  %p92_p5 = por %p91_p13, %p90_p12 }
  0x19   : > { %s1119_s29 = sshll.u32 %s287_s22, 4  ;;  %s296_s11 = scalar_lea.hbm %s1842_s2, %s1300_s23 }
  0x1a   : > { %s297_s13 = sshll.u32 %s296_s11, 4  ;;  %s291_s14 = scalar_lea.vmem [#allocation3], %s1119_s29  ;;  %s298_s13 = int_to_ptr.hbm [resolvable:$true] %s297_s13 }
  0x1b   : > { %s299_s18 = sshll.u32 %s291_s14, 4  ;;  %p1685_p7 = pnand %p1368_p3, %p92_p5  ;;  %s300_s18 = int_to_ptr.vmem [resolvable:$true] %s299_s18 }
  0x1c   : > { %s288_s16 = scalar_lea.sflag [#allocation4], %s287_s22  ;;  %s1447_s17 = sshra.s32 %s298_s13, 4  ;;  %s1448_s17 = int_to_ptr.hbm [resolvable:$true] %s1447_s17 }
  0x1d   : > { %s1449_s6 = scalar_lea.hbm %s1448_s17, 16  ;;  %p1451_p9 = pneg %p1685_p7 }
  0x1e   : > { %p1450_p2 = scmp.ne.s32.totalorder %s1448_s17, %s1449_s6  ;;  %s1454_s29 = scalar_lea.hbm %s1842_s2, 48 }
  0x1f   : > { %p1455_p12 = scmp.lt.s32.totalorder %s1448_s17, %s1842_s2  ;;  %p1456_p13 = scmp.lt.s32.totalorder %s1454_s29, %s1449_s6 }
  0x20   : > { %p1452_p10 = pnand %p1451_p9, %p1450_p2 }
  0x21   : > { %p1457_p3 = por %p1456_p13, %p1455_p12 }
  0x22   : > { %p1453_p11 = pneg %p1452_p10 }
  0x24   : > { %p1458_p5 = pnand %p1457_p3, %p1453_p11 }
  0x26   : > { %1461 = shalt.err (!%p1458_p5)
}
  0x27   : > { %s1858_s22 = smov 4   ;;  %s1859_s14 = smov 64  }
  0x28   : > { %1362 = dma.hbm_to_vmem [thread:$0]  (!%p1685_p7), %s298_s13, 256, %s300_s18, %s288_s16, %s1859_s14, %s1859_s14, %s1858_s22  }
  0x29   : > { %311 = sbr.rel (%p1650_p8) target bundleno = 660 (0x294), region = 48  ;;  %s1705_s23 = sand.u32 (!%p1650_p8), 1, %s1550_s25  }
  0x2a   : > { %s1123_s6 = sshll.u32 (!%p1650_p8), %s1705_s23, 4  ;;  %s314_s17 = scalar_lea.sflag (!%p1650_p8), [#allocation4], %s1705_s23 }
  0x2b   : > { %s317_s9 = scalar_lea.vmem (!%p1650_p8), [#allocation3], %s1123_s6 }
  0x2e   : > { %1533 = dma.done.wait (%p1637_p4), %s314_s17, 256  }
  0x2f   : > { %1535 = vsyncadd (%p1637_p4), %s314_s17, 4294967040 }
  0x30   : > { %1537 = dma.done.wait (%p97_p1), [#allocation7], 5120  }
  0x31   : > { %1539 = vsyncadd (%p97_p1), [#allocation7], 4294962176  ;;  %s1720_s12 = sshll.u32 %s1628_s28, 1  ;;  %s1130_s16 = sshll.u32 %s1628_s28, 4  ;;  %v406_v0 = vlaneseq  ;;  %v1563_v1 = vmov 0   ;;  %v501_v7 = vld [vmem:[%s317_s9] sm:$0xff]  }
  0x32   : > { %1409 = vset.pattern.permute.xlu0 %v1563_v1  ;;  %p377_p8 = scmp.lt.s32.totalorder %s1720_s12, 4  ;;  %v409_v2 = vstv %s1130_s16  ;;  %v508_v8 = vld [vmem:[%s317_s9 + $0x8] sm:$0xff]   ;;  %503 = vst [vmem:[#allocation2] sm:$0xff] %v501_v7   ;;  %v1307_v31 = vld [vmem:[#allocation6 + $0x30] sm:$0xff]  ;;  %v1305_v34 = vld [vmem:[#allocation6 + $0x20] sm:$0xff]  ;;  %vm539_vm15 = vcmask 1045504  }
  0x33   : > { %v407_v3 = vshrl.u32 %v406_v0, 7  ;;  %510 = vst [vmem:[#allocation2 + $0x10] sm:$0xff] %v508_v8   ;;  %v435_v19 = vand.u32 127, %v406_v0  ;;  %v1308_v30 = vld [vmem:[#allocation6 + $0x38] sm:$0xff]  ;;  %v1306_v32 = vld [vmem:[#allocation6 + $0x28] sm:$0xff]  ;;  %v1323_v37 = vld [vmem:[#allocation6 + $0xb0] sm:$0xff] }
  0x34   : > { %s378_s30 = scalar_select %p377_p8, %s1720_s12, 4  ;;  %592 = vmatpush.bf16.msra.mxu0 %v1308_v30  ;;  %v1324_v33 = vld [vmem:[#allocation6 + $0xb8] sm:$0xff]  ;;  %v1315_v39 = vld [vmem:[#allocation6 + $0x70] sm:$0xff]  ;;  %v1322_v41 = vld [vmem:[#allocation6 + $0xa8] sm:$0xff] }
  0x35   : > { %v1727_v4 = vadd.s32 %v409_v2, %v407_v3  ;;  %v408_v5 = vadd.s32 8, %v407_v3  ;;  %vm436_vm8 = vcmp.lt.s32.totalorder %v435_v19, 32  ;;  %773 = vmatpush.bf16.msra.mxu2 %v1324_v33  ;;  %v1316_v35 = vld [vmem:[#allocation6 + $0x78] sm:$0xff]  ;;  %v1331_v40 = vld [vmem:[#allocation6 + $0xf0] sm:$0xff]  ;;  %v1314_v43 = vld [vmem:[#allocation6 + $0x68] sm:$0xff]  ;;  %s371_s19 = scalar_lea.vmem [#allocation8], %s1123_s6 }
  0x36   : > { %s1127_s13 = sshll.u32 %s378_s30, 3  ;;  %v1332_v36 = vld [vmem:[#allocation6 + $0xf8] sm:$0xff]  ;;  %688 = vmatpush.bf16.msra.mxu1 %v1316_v35  ;;  %v1303_v42 = vld [vmem:[#allocation6 + $0x10] sm:$0xff]  ;;  %v1330_v44 = vld [vmem:[#allocation6 + $0xe8] sm:$0xff]  ;;  %s994_s10 = ssub.s32 (%p1675_p0), 5, %s1720_s12 }
  0x37   : > { %s380_s29 = scalar_lea.vmem %s1840_s0, %s1127_s13  ;;  %vm412_vm0 = vcmp.lt.s32.totalorder %v1727_v4, 36  ;;  %v1733_v6 = vadd.s32 %v409_v2, %v408_v5  ;;  %s394_s22 = scalar_lea.vmem %s1841_s1, %s1127_s13  ;;  %869 = vmatpush.bf16.msra.mxu3 %v1332_v36  ;;  %v1304_v38 = vld [vmem:[#allocation6 + $0x18] sm:$0xff]  ;;  %v1321_v45 = vld [vmem:[#allocation6 + $0xa0] sm:$0xff]  ;;  %v1302_v48 = vld [vmem:[#allocation6 + $0x8] sm:$0xff] }
  0x38   : > { %v414_v9 = vld [vmem:[%s380_s29] sm:$0xff]  ;;  %v415_v10 = vld [vmem:[%s380_s29 + $0x8] sm:$0xff]  ;;  %593 = vmatpush.bf16.msra.mxu0 %v1307_v31  ;;  %v1313_v49 = vld [vmem:[#allocation6 + $0x60] sm:$0xff]  ;;  %s986_s29 = scalar_lea.sflag [#allocation5], %s1705_s23  ;;  %p995_p1 = scmp.lt.s32.totalorder (%p1675_p0), %s994_s10, 2 }
  0x39   : > { %vm416_vm1 = vcmp.gt.f32.partialorder %v414_v9, 0.5  ;;  %vm413_vm3 = vcmp.lt.s32.totalorder %v1733_v6, 36  ;;  %vm417_vm4 = vcmp.gt.f32.partialorder %v415_v10, 0.5  ;;  %v1743_v13 = vld [vmem:[%s394_s22] sm:$0xff]  ;;  %v1746_v16 = vld [vmem:[%s394_s22 + $0x8] sm:$0xff]  ;;  %774 = vmatpush.bf16.msra.mxu2 %v1323_v37  ;;  %v1329_v50 = vld [vmem:[#allocation6 + $0xe0] sm:$0xff] }
  0x3a   : > { %vm418_vm2 = vmand %vm416_vm1, %vm412_vm0  ;;  %689 = vmatpush.bf16.msra.mxu1 %v1315_v39  ;;  %v1320_v52 = vld [vmem:[#allocation6 + $0x98] sm:$0xff]  ;;  %v1301_v53 = vld [vmem:[#allocation6] sm:$0xff]  ;;  %vm816_vm1 = vcmask 1046528  }
  0x3b   : > { %v422_v11 = vsel %vm418_vm2, 1, %v1563_v1  ;;  %vm419_vm5 = vmand %vm417_vm4, %vm413_vm3  ;;  %870 = vmatpush.bf16.msra.mxu3 %v1331_v40  ;;  %v1312_v54 = vld [vmem:[#allocation6 + $0x58] sm:$0xff]  ;;  %v1319_v57 = vld [vmem:[#allocation6 + $0x90] sm:$0xff] }
  0x3c   : > { %425 = vperm.xlu0 %1409, %v422_v11   ;;  %v423_v12 = vsel %vm419_vm5, 1, %v1563_v1  ;;  %594 = vmatpush.bf16.msra.mxu0 %v1306_v32  ;;  %v1328_v55 = vld [vmem:[#allocation6 + $0xd8] sm:$0xff]  ;;  %v1311_v59 = vld [vmem:[#allocation6 + $0x50] sm:$0xff]  ;;  %v1318_v63 = vld [vmem:[#allocation6 + $0x88] sm:$0xff] }
  0x3d   : > { %775 = vmatpush.bf16.msra.mxu2 %v1322_v41  ;;  %v1340_v56 = vld [vmem:[#allocation6 + $0x138] sm:$0xff]  ;;  %v1327_v60 = vld [vmem:[#allocation6 + $0xd0] sm:$0xff]  ;;  %v1310_v3 = vld [vmem:[#allocation6 + $0x48] sm:$0xff] }
  0x3e   : > { %690 = vmatpush.bf16.msra.mxu1 %v1314_v43  ;;  %v1339_v62 = vld [vmem:[#allocation6 + $0x130] sm:$0xff]  ;;  %v1326_v5 = vld [vmem:[#allocation6 + $0xc8] sm:$0xff]  ;;  %v1317_v8 = vld [vmem:[#allocation6 + $0x80] sm:$0xff] }
  0x3f   : > { %871 = vmatpush.bf16.msra.mxu3 %v1330_v44  ;;  %v1338_v7 = vld [vmem:[#allocation6 + $0x128] sm:$0xff]  ;;  %v1309_v11 = vld [vmem:[#allocation6 + $0x40] sm:$0xff] }
  0x40   : > { %595 = vmatpush.bf16.msra.mxu0 %v1305_v34  ;;  %v1411_v31 = vld [vmem:[%s1844_s4] ss:$0 sm:$0xff]  ;;  %v512_v43 = vld [vmem:[#allocation2 + $0x4] sm:$0xc] }
  0x41   : > { %776 = vmatpush.bf16.msra.mxu2 %v1321_v45  ;;  %v1334_v33 = vld [vmem:[#allocation6 + $0x108] sm:$0xff] }
  0x42   : > { %691 = vmatpush.bf16.msra.mxu1 %v1313_v49  ;;  %v611_v44 = vld [vmem:[#allocation2 + $0x4] sm:$0x8] }
  0x43   : > { %872 = vmatpush.bf16.msra.mxu3 %v1329_v50 }
  0x44   : > { %428 = vperm.xlu0 %1409, %v423_v12   ;;  %596 = vmatpush.bf16.msra.mxu0 %v1304_v38 }
  0x45   : > { %777 = vmatpush.bf16.msra.mxu2 %v1320_v52 }
  0x46   : > { %692 = vmatpush.bf16.msra.mxu1 %v1312_v54 }
  0x47   : > { %873 = vmatpush.bf16.msra.mxu3 %v1328_v55 }
  0x48   : > { %597 = vmatpush.bf16.msra.mxu0 %v1303_v42  ;;  %v791_v42 = vld [vmem:[#allocation2 + $0x10] sm:$0x1] }
  0x49   : > { %778 = vmatpush.bf16.msra.mxu2 %v1319_v57  ;;  %v813_v45 = vunpack.c.l.b16 %v791_v42 }
  0x4a   : > { %693 = vmatpush.bf16.msra.mxu1 %v1311_v59 }
  0x4b   : > { %874 = vmatpush.bf16.msra.mxu3 %v1327_v60  ;;  %v815_v50 = vpack.c.b16 %v813_v45, %v813_v45 }
  0x4c   : > { %598 = vmatpush.bf16.msra.mxu0 %v1302_v48 }
  0x4d   : > { %779 = vmatpush.bf16.msra.mxu2 %v1318_v63 }
  0x4e   : > { %694 = vmatpush.bf16.msra.mxu1 %v1310_v3 }
  0x4f   : > { %875 = vmatpush.bf16.msra.mxu3 %v1326_v5 }
  0x50   : > { %599 = vmatpush.bf16.msra.mxu0 %v1301_v53 }
  0x51   : > { %780 = vmatpush.bf16.msra.mxu2 %v1317_v8 }
  0x52   : > { %695 = vmatpush.bf16.msra.mxu1 %v1309_v11 }
  0x54   : > { %961 = vmatpush.bf16.msrb.mxu0 %v1340_v56 }
  0x58   : > { %962 = vmatpush.bf16.msrb.mxu0 %v1339_v62 }
  0x5c   : > { %963 = vmatpush.bf16.msrb.mxu0 %v1338_v7 }
  0xae   : > { %v426_v14 = vpop.permute.xlu0 %425 }
  0xaf   : > { %vm430_vm6 = vcmp.eq.s32.totalorder %v426_v14, 1  ;;  %v1325_v14 = vld [vmem:[#allocation6 + $0xc0] sm:$0xff] }
  0xb0   : > { %v432_v15 = vsel %vm430_vm6, %v1743_v13, 0.0  ;;  %876 = vmatpush.bf16.msra.mxu3 %v1325_v14 }
  0xb1   : > { %437 = vadd.xlane.f32.xlu1 %v432_v15 }
  0xb6   : > { %v429_v17 = vpop.permute.xlu0 %428 }
  0xb7   : > { %vm431_vm7 = vcmp.eq.s32.totalorder %v429_v17, 1 }
  0xb8   : > { %v433_v18 = vsel %vm431_vm7, %v1746_v16, 0.0 }
  0xb9   : > { %439 = vadd.xlane.f32.xlu1 %v433_v18 }
 0x124   : > { %v438_v20 = vpop.xlane.xlu1 %437 }
 0x125   : > { %v441_v21 = vmul.f32 0.03125, %v438_v20 }
 0x127   : > { %v443_v22 = vsub.f32 %v432_v15, %v441_v21  ;;  %v1337_v15 = vld [vmem:[#allocation6 + $0x120] sm:$0xff] }
 0x128   : > { %964 = vmatpush.bf16.msrb.mxu0 %v1337_v15 }
 0x129   : > { %v1749_v23 = vsel %vm436_vm8, %v443_v22, 0.0  ;;  %v1336_v22 = vld [vmem:[#allocation6 + $0x118] sm:$0xff] }
 0x12a   : > { %v449_v24 = vmul.f32 %v1749_v23, %v1749_v23 }
 0x12c   : > { %451 = vadd.xlane.f32.xlu2 %v449_v24  ;;  %v440_v25 = vpop.xlane.xlu1 %439  ;;  %965 = vmatpush.bf16.msrb.mxu0 %v1336_v22 }
 0x12d   : > { %v442_v26 = vmul.f32 0.03125, %v440_v25  ;;  %v1410_v25 = vld [vmem:[%s1843_s3] ss:$0 sm:$0xff] }
 0x12f   : > { %v444_v27 = vsub.f32 %v433_v18, %v442_v26 }
 0x131   : > { %v1753_v28 = vsel %vm436_vm8, %v444_v27, 0.0  ;;  %v1335_v27 = vld [vmem:[#allocation6 + $0x110] sm:$0xff] }
 0x132   : > { %v450_v29 = vmul.f32 %v1753_v28, %v1753_v28  ;;  %966 = vmatpush.bf16.msrb.mxu0 %v1335_v27 }
 0x134   : > { %453 = vadd.xlane.f32.xlu2 %v450_v29 }
 0x136   : > { %967 = vmatpush.bf16.msrb.mxu0 %v1334_v33 }
 0x19f   : > { %v452_v46 = vpop.xlane.xlu2 %451 }
 0x1a0   : > { %v455_v47 = vmul.f32 0.03125, %v452_v46  ;;  %v534_v46 = vunpack.c.l.b16 %v512_v43 }
 0x1a2   : > { %v457_v51 = vadd.f32 1e-05, %v455_v47 }
 0x1a4   : > { %1413 = vrsqrt.f32 %v457_v51  ;;  %vm465_vm10 = vweird.f32 %v457_v51 }
 0x1a7   : > { %v454_v58 = vpop.xlane.xlu2 %453 }
 0x1a8   : > { %v456_v61 = vmul.f32 0.03125, %v454_v58 }
 0x1aa   : > { %v1414_v0 = vpop.eup %1413  ;;  %v458_v1 = vadd.f32 1e-05, %v456_v61  ;;  %v818_v61 = vrot.slane %v815_v50, 1 }
 0x1ab   : > { %v460_v2 = vmul.f32 %v1414_v0, %v457_v51  ;;  %vm466_vm9 = vweird.f32 %v1414_v0 }
 0x1ac   : > { %1415 = vrsqrt.f32 %v458_v1  ;;  %vm467_vm11 = vmor %vm465_vm10, %vm466_vm9  ;;  %vm475_vm13 = vweird.f32 %v458_v1 }
 0x1ad   : > { %v461_v9 = vmul.f32 %v1414_v0, %v460_v2 }
 0x1af   : > { %v462_v10 = vmul.f32 0.5, %v461_v9  ;;  %v886_v9 = vld [vmem:[#allocation2 + $0x10] sm:$0x3] }
 0x1b0   : > { %v906_v11 = vunpack.c.l.b16 %v886_v9 }
 0x1b1   : > { %v463_v12 = vsub.f32 1.5, %v462_v10 }
 0x1b2   : > { %v1416_v17 = vpop.eup %1415  ;;  %v908_v14 = vpack.c.b16 %v906_v11, %v906_v11 }
 0x1b3   : > { %v464_v18 = vmul.f32 %v1414_v0, %v463_v12  ;;  %v470_v19 = vmul.f32 %v1416_v17, %v458_v1  ;;  %vm476_vm12 = vweird.f32 %v1416_v17 }
 0x1b4   : > { %vm477_vm14 = vmor %vm475_vm13, %vm476_vm12 }
 0x1b5   : > { %v468_v20 = vsel %vm467_vm11, %v1414_v0, %v464_v18  ;;  %v471_v21 = vmul.f32 %v1416_v17, %v470_v19  ;;  %v1412_v19 = vld [vmem:[%s1845_s5] ss:$0 sm:$0xff] }
 0x1b6   : > { %v479_v26 = vmul.f32 %v468_v20, %v1749_v23  ;;  %v1333_v23 = vld [vmem:[#allocation6 + $0x100] sm:$0xff] }
 0x1b7   : > { %v472_v24 = vmul.f32 0.5, %v471_v21  ;;  %968 = vmatpush.bf16.msrb.mxu0 %v1333_v23 }
 0x1b8   : > { %v485_v32 = vmul.f32 %v1410_v25, %v479_v26 }
 0x1b9   : > { %v473_v29 = vsub.f32 1.5, %v472_v24 }
 0x1ba   : > { %v491_v36 = vadd.f32 %v1411_v31, %v485_v32 }
 0x1bb   : > { %v474_v30 = vmul.f32 %v1416_v17, %v473_v29 }
 0x1bc   : > { %v497_v39 = vsel %vm412_vm0, %v491_v36, 0.0  ;;  %vm635_vm0 = vcmask 1044480  }
 0x1bd   : > { %v478_v34 = vsel %vm477_vm14, %v1416_v17, %v474_v30  ;;  %v910_v17 = vrot.slane %v908_v14, 2 }
 0x1be   : > { %v480_v35 = vmul.f32 %v478_v34, %v1753_v28  ;;  %v631_v28 = vunpack.c.l.b16 %v611_v44 }
 0x1c0   : > { %v486_v37 = vmul.f32 %v1410_v25, %v480_v35 }
 0x1c2   : > { %v492_v38 = vadd.f32 %v1411_v31, %v486_v37 }
 0x1c4   : > { %v498_v40 = vsel %vm413_vm3, %v492_v38, 0.0 }
 0x1c5   : > { %v1345_v41 = vpack.c.bf16 %v498_v40, %v497_v39 }
 0x1c7   : > { %1347 = vst [vmem:[#allocation2 + $0x8] sm:$0xff] %v1345_v41  }
 0x1ce   : > { %v513_v47 = vld [vmem:[#allocation2 + $0x8] sm:$0xff]  }
 0x1cf   : > { %v514_v48 = vld [vmem:[#allocation2 + $0xc] sm:$0x3]  ;;  %v535_v51 = vunpack.c.l.b16 %v513_v47  ;;  %v789_v53 = vld [vmem:[#allocation2 + $0x8] sm:$0xe]  ;;  %781 = vmatmul.bf16.vlgmr.msra.gmra.mxu2 %v513_v47 }
 0x1d0   : > { %v612_v49 = vld [vmem:[#allocation2 + $0xc] sm:$0x7]  ;;  %v536_v52 = vunpack.c.l.b16 %v514_v48  ;;  %v811_v6 = vunpack.c.l.b16 %v789_v53  ;;  %v885_v8 = vld [vmem:[#allocation2 + $0x8] sm:$0xc] }
 0x1d1   : > { %v632_v4 = vunpack.c.l.b16 %v612_v49  ;;  %v790_v54 = vld [vmem:[#allocation2 + $0xc] sm:$0xf]  ;;  %v537_v56 = vpack.c.b16 %v535_v51, %v534_v46  ;;  %v633_v58 = vpack.c.b16 %v535_v51, %v631_v28  ;;  %v905_v10 = vunpack.c.l.b16 %v885_v8 }
 0x1d2   : > { %v812_v55 = vunpack.c.l.b16 %v790_v54  ;;  %v538_v57 = vpack.c.b16 %v536_v52, %v536_v52 }
 0x1d3   : > { %v634_v59 = vpack.c.b16 %v632_v4, %v632_v4  ;;  %v540_v62 = vrot.slane %v537_v56, 2  ;;  %v636_v0 = vrot.slane %v633_v58, 3 }
 0x1d4   : > { %v814_v60 = vpack.c.b16 %v812_v55, %v811_v6  ;;  %v541_v63 = vrot.slane %v538_v57, 2  ;;  %v907_v12 = vpack.c.b16 %v812_v55, %v905_v10 }
 0x1d5   : > { %v637_v1 = vrot.slane %v634_v59, 3 }
 0x1d6   : > { %v817_v2 = vrot.slane %v814_v60, 1  ;;  %v542_v3 = vsel %vm539_vm15, %v540_v62, %v541_v63  ;;  %v909_v15 = vrot.slane %v907_v12, 2 }
 0x1d7   : > { %600 = vmatmul.bf16.vlgmr.msra.gmra.mxu0 %v542_v3  ;;  %v638_v5 = vsel %vm635_vm0, %v636_v0, %v637_v1 }
 0x1d8   : > { %v819_v7 = vsel %vm816_vm1, %v817_v2, %v818_v61  ;;  %696 = vmatmul.bf16.vlgmr.msra.gmra.mxu1 %v638_v5  ;;  %v911_v18 = vsel %vm539_vm15, %v909_v15, %v910_v17 }
 0x1d9   : > { %877 = vmatmul.bf16.vlgmr.msra.gmra.mxu3 %v819_v7 }
 0x1e7   : > { %969 = vmatmul.bf16.vlgmr.msrb.gmra.mxu0 %v911_v18 }
 0x252   : > { %v782_v24 = vpop.f32.mrf.mxu2 }
 0x254   : > { %v601_v20 = vpop.f32.mrf.mxu0 }
 0x255   : > { %v609_v21 = vadd.f32 %v1412_v19, %v601_v20  ;;  %v697_v22 = vpop.f32.mrf.mxu1 }
 0x257   : > { %v702_v25 = vadd.f32 %v697_v22, %v609_v21 }
 0x259   : > { %v787_v29 = vadd.f32 %v782_v24, %v702_v25 }
 0x25a   : > { %v784_v34 = vpop.f32.mrf.mxu2 }
 0x25c   : > { %v603_v26 = vpop.f32.mrf.mxu0  ;;  %v878_v27 = vpop.f32.mrf.mxu3 }
 0x25d   : > { %v610_v30 = vadd.f32 %v1412_v19, %v603_v26  ;;  %v699_v31 = vpop.f32.mrf.mxu1  ;;  %v883_v32 = vadd.f32 %v878_v27, %v787_v29 }
 0x25f   : > { %v703_v33 = vadd.f32 %v699_v31, %v610_v30 }
 0x261   : > { %v788_v37 = vadd.f32 %v784_v34, %v703_v33 }
 0x264   : > { %v970_v35 = vpop.f32.mrf.mxu0  ;;  %v880_v38 = vpop.f32.mrf.mxu3 }
 0x265   : > { %v975_v36 = vadd.f32 %v970_v35, %v883_v32  ;;  %v884_v40 = vadd.f32 %v880_v38, %v788_v37 }
 0x267   : > { %v977_v23 = vmax.f32 %v975_v36, 0.0 }
 0x269   : > { %v981_v39 = vadd.f32 %v977_v23, %v1743_v13 }
 0x26b   : > { %983 = vst [vmem:[%s371_s19] sm:$0xff] %v981_v39 }
 0x26c   : > { %v972_v41 = vpop.f32.mrf.mxu0 }
 0x26d   : > { %v976_v42 = vadd.f32 %v972_v41, %v884_v40 }
 0x26f   : > { %v978_v43 = vmax.f32 %v976_v42, 0.0  ;;  %992 = sbr.rel (!%p1675_p0) target bundleno = 660 (0x294), region = 60 }
 0x271   : > { %v982_v44 = vadd.f32 %v978_v43, %v1746_v16 }
 0x273   : > { %984 = vst [vmem:[%s371_s19 + $0x8] sm:$0xff] %v982_v44 }
 0x274   : > { %s1867_s10 = smov (!%p995_p1, %s994_s10), 2 }
 0x275   : > { %s1293_s11 = sshll.u32 %s1867_s10, 3 }
 0x276   : > { %s998_s6 = ssub.s32 16, %s1293_s11 }
 0x277   : > { %s999_s22 = sshll.u32 %s998_s6, 4 }
 0x278   : > { %1000 = vsyncadd %s986_s29, %s999_s22  ;;  %p1787_p4 = scmp.ne.s32.totalorder %s1293_s11, 0  ;;  %s1003_s12 = scalar_lea.hbm %s1847_s7, %s1130_s16 }
 0x279   : > { %s1005_s9 = sshll.u32 %s371_s19, 4  ;;  %s1007_s30 = sshll.u32 %s1003_s12, 4  ;;  %s1796_s9 = int_to_ptr.vmem [resolvable:$true] %s1005_s9  ;;  %s1798_s30 = int_to_ptr.hbm [resolvable:$true] %s1007_s30 }
 0x27a   : > { %s1850_s13 = sshll.u32 %s1867_s10, 7  ;;  %s1477_s18 = sshra.s32 %s1796_s9, 4  ;;  %s1478_s18 = int_to_ptr.vmem [resolvable:$true] %s1477_s18 }
 0x27b   : > { %s1479_s11 = sshrl.u32 %s1850_s13, 4  ;;  %s1564_s28 = smov [#allocation8]  }
 0x27c   : > { %s1484_s6 = scalar_lea.vmem %s1478_s18, %s1479_s11  ;;  %s1488_s22 = scalar_lea.vmem %s1564_s28, 32 }
 0x27d   : > { %p1485_p0 = scmp.ne.s32.totalorder %s1478_s18, %s1484_s6  ;;  %p1490_p9 = scmp.lt.s32.totalorder %s1488_s22, %s1484_s6 }
 0x27f   : > { %p1486_p7 = pnand %p1485_p0, %p1787_p4 }
 0x281   : > { %p1487_p2 = pneg %p1486_p7 }
 0x283   : > { %p1492_p10 = pnand %p1490_p9, %p1487_p2 }
 0x285   : > { %1495 = shalt.err (!%p1492_p10)
}
 0x286   : > { %s1496_s16 = sshra.s32 %s1798_s30, 4  ;;  %s1507_s12 = scalar_lea.hbm %s1847_s7, 40  ;;  %s1497_s16 = int_to_ptr.hbm [resolvable:$true] %s1496_s16 }
 0x287   : > { %s1503_s19 = scalar_lea.hbm %s1497_s16, %s1479_s11  ;;  %p1508_p3 = scmp.lt.s32.totalorder %s1497_s16, %s1847_s7 }
 0x288   : > { %p1504_p11 = scmp.ne.s32.totalorder %s1497_s16, %s1503_s19  ;;  %p1509_p5 = scmp.lt.s32.totalorder %s1507_s12, %s1503_s19 }
 0x28a   : > { %p1505_p12 = pnand %p1504_p11, %p1787_p4  ;;  %p1510_p8 = por %p1509_p5, %p1508_p3 }
 0x28c   : > { %p1506_p13 = pneg %p1505_p12 }
 0x28e   : > { %p1511_p1 = pnand %p1510_p8, %p1506_p13 }
 0x290   : > { %1514 = shalt.err (!%p1511_p1)
}
 0x291   : > { %s1565_s6 = smov 128   ;;  %s1566_s11 = smov 8  }
 0x292   : > { %s1861_s28 = sshll.u32 %s1867_s10, 7 }
 0x293   : > { %1013 = dma.vmem_to_hbm [thread:$0]  (%p1787_p4), %s1796_s9, %s1861_s28, %s1798_s30, %s986_s29, %s1565_s6, %s1565_s6, %s1566_s11  }
 0x294 PF: > { %p1370_p0 = scmp.ge.s32.totalorder %s1558_s27, 2  ;;  %s1022_s13 = sand.u32 1, %s1546_s24  }
 0x295   : > { %s1023_s22 = scalar_lea.sflag [#allocation5], %s1022_s13 }
 0x296   : > { %p1364_p7 = pnand %p1370_p0, %p1642_p6 }
 0x298   : > { %p1365_p2 = pneg %p1364_p7 }
 0x29a   : > { %1541 = dma.done.wait (%p1365_p2), %s1023_s22, 256  }
 0x29b   : > { %1543 = vsyncadd (%p1365_p2), %s1023_s22, 4294967040  ;;  %p21_p9 = scmp.ge.s32.totalorder %s1659_s15, 5   ;;  %s1862_s24 = smov %s1550_s25 }
 0x29c   : > { %s1863_s25 = smov %s1554_s26  ;;  %s1864_s26 = smov %s1671_s20 }
 0x29d   : > { %s1865_s27 = smov %s1659_s15  ;;  %23 = sbr.rel (!%p21_p9) target bundleno = 8 (0x8), region = 103 }
 0x2a2   :  { %1029 = vsyncpa [#allocation4], 1 }
 0x2a3   :  { %1031 = vsyncpa [#allocation4 + $0x1], 1 }
 0x2a4   :  { %1032 = vsyncpa [#allocation7], 1 }
 0x2a5   :  { %1033 = vsyncpa [#allocation5], 1 }
 0x2a6   :  { %1035 = vsyncpa [#allocation5 + $0x1], 1 }

</bundles_post_ra>
